<compile_context>
chip_gen: v6e
topology: v6e:2x2x1
jax: 0.10.0
libtpu: 0.0.40
codegen_flags: <defaults>
</compile_context>

<pallas_src>
import functools

import numpy as np
import jax
import jax.numpy as jnp
from jax.experimental import pallas as pl
from jax.experimental.pallas import tpu as pltpu


# ------------------------------ fused kernel --------------------------------

def _fcn_fused_kernel(xs_ref, ws_ref, bs_ref, wb_ref, bb_ref, wh_ref, bh_ref,
                      wc_ref, bc_ref, mu_ref, o_ref, *, scale):
    """Whole forward pass for ONE batch element; all intermediates in VMEM.

    xs_ref : (1, Hs, Ws, 12)  padded + space-to-depth stem input (f32)
    ws_ref : (4*12,  C0) bf16 stem weights (2x2 s1 conv == 3x3/s2/p1 conv)
    wb_ref : (9*C0,  C1) bf16 block-conv weights
    wh_ref : (9*C1,  C2) bf16 head-conv weights
    wc_ref : (1, C2)     f32  1x1 classifier weight (Cout=1 -> VPU path)
    mu_ref : (Ho*Wo, H*W) f32 kron(Ah, Aw)^T (bilinear upsample + flatten)
    o_ref  : (1, 1, H*W)
    """

    def pad1(x):
        # zero-pad H (leading, untiled dim) and W (sublane dim) by 1 each side
        h, w, c = x.shape
        zr = jnp.zeros((1, w, c), x.dtype)
        x = jnp.concatenate([zr, x, zr], axis=0)            # (h+2, w,   c)
        zc = jnp.zeros((h + 2, 1, c), x.dtype)
        return jnp.concatenate([zc, x, zc], axis=1)         # (h+2, w+2, c)

    def conv(xp, w_ref, b_ref, kh, kw):
        # single im2col matmul: (Ho*Wo, kh*kw*Cin) @ (kh*kw*Cin, Cout)
        hp, wp, cin = xp.shape
        ho, wo = hp - kh + 1, wp - kw + 1
        cols = []
        for di in range(kh):
            for dj in range(kw):
                cols.append(xp[di:di + ho, dj:dj + wo, :].reshape(ho * wo, cin))
        a = jnp.concatenate(cols, axis=-1).astype(jnp.bfloat16)   # one bf16 cast
        acc = jnp.dot(a, w_ref[...], preferred_element_type=jnp.float32)
        acc = acc + b_ref[...]
        return jnp.maximum(acc, 0.0), ho, wo                      # (Ho*Wo, Cout) f32

    xs = xs_ref[0]                                                # (Hs, Ws, 12)
    h0, ho, wo = conv(xs, ws_ref, bs_ref, 2, 2)                   # stem
    h1, _, _ = conv(pad1(h0.reshape(ho, wo, -1)), wb_ref, bb_ref, 3, 3)
    h2, _, _ = conv(pad1(h1.reshape(ho, wo, -1)), wh_ref, bh_ref, 3, 3)  # (Ho*Wo, C2)

    # 1x1 classifier, Cout=1: VPU multiply + lane reduce (no masked MXU store)
    z = jnp.sum(h2 * wc_ref[...], axis=-1, keepdims=True) + bc_ref[...]  # (Ho*Wo, 1)

    # bilinear upsample + row-major flatten fused into one transposed-LHS dot:
    #   y[0, a*W + b] = sum_k kron(Ah, Aw)[a*W + b, k] * z[k, 0]
    y = jax.lax.dot_general(z, mu_ref[...],
                            dimension_numbers=(((0,), (0,)), ((), ())),
                            preferred_element_type=jnp.float32)          # (1, H*W)

    o_ref[0] = (scale * jax.nn.sigmoid(y)).astype(o_ref.dtype)           # lane-dense


# ------------------------------ Pallas driver --------------------------------

def _fused_forward(xs, w_stem, b_stem, w_blk, b_blk, w_h1, b_h1,
                   w_cls, b_cls, m_up_t, scale):
    """xs: (N, Hs, Ws, 12) -> (N, H*W)."""
    n = xs.shape[0]
    hw = m_up_t.shape[1]

    # vmem budget from actual (double-buffered) block sizes + relayout headroom
    def nbytes(shape, itemsize):
        return int(np.prod(shape)) * itemsize
    block_bytes = (
        nbytes(xs.shape[1:], 4) + nbytes(w_stem.shape, 2) + nbytes(b_stem.shape, 4)
        + nbytes(w_blk.shape, 2) + nbytes(b_blk.shape, 4)
        + nbytes(w_h1.shape, 2) + nbytes(b_h1.shape, 4)
        + nbytes(w_cls.shape, 4) + nbytes(b_cls.shape, 4)
        + nbytes(m_up_t.shape, 4) + hw * 4)
    vmem_limit = int(min(64 * 1024 * 1024,
                         max(4 * 1024 * 1024,
                             2 * block_bytes + 2 * 1024 * 1024)))

    out = pl.pallas_call(
        functools.partial(_fcn_fused_kernel, scale=float(scale)),
        out_shape=jax.ShapeDtypeStruct((n, 1, hw), jnp.float32),
        grid=(n,),
        in_specs=[
            pl.BlockSpec((1,) + xs.shape[1:], lambda b: (b, 0, 0, 0)),
            pl.BlockSpec(w_stem.shape, lambda b: (0, 0)),   # resident weights
            pl.BlockSpec(b_stem.shape, lambda b: (0, 0)),
            pl.BlockSpec(w_blk.shape, lambda b: (0, 0)),
            pl.BlockSpec(b_blk.shape, lambda b: (0, 0)),
            pl.BlockSpec(w_h1.shape, lambda b: (0, 0)),
            pl.BlockSpec(b_h1.shape, lambda b: (0, 0)),
            pl.BlockSpec(w_cls.shape, lambda b: (0, 0)),
            pl.BlockSpec(b_cls.shape, lambda b: (0, 0)),
            pl.BlockSpec(m_up_t.shape, lambda b: (0, 0)),
        ],
        out_specs=pl.BlockSpec((1, 1, hw), lambda b: (b, 0, 0)),
        compiler_params=pltpu.CompilerParams(
            dimension_semantics=("parallel",),   # batch -> megacore / v7x 2 TCs
            vmem_limit_bytes=vmem_limit),
    )(xs, w_stem, b_stem, w_blk, b_blk, w_h1, b_h1, w_cls, b_cls, m_up_t)
    return out.reshape(n, hw)


# ------------------------------- host helpers --------------------------------

def _stem_weights_s2d(w):
    """Remap a (3,3,Cin,Cout) stride-2 conv weight into the exactly-equivalent
    (2*2, 4*Cin, Cout) stride-1 conv over the space-to-depth input."""
    w = np.asarray(w)
    cin, cout = w.shape[2], w.shape[3]
    w2 = np.zeros((2, 2, 4 * cin, cout), np.float32)
    for bi in range(2):
        for bj in range(2):
            for ri in range(2):
                for rj in range(2):
                    di, dj = 2 * bi + ri, 2 * bj + rj
                    if di < 3 and dj < 3:
                        c0 = (ri * 2 + rj) * cin
                        w2[bi, bj, c0:c0 + cin, :] = w[di, dj]
    return w2.reshape(4, 4 * cin, cout)


def _bilinear_matrix(n_in, n_out):
    """Interpolation matrix matching F.interpolate(mode='bilinear', align_corners=False)."""
    o = np.arange(n_out, dtype=np.float64)
    s = (o + 0.5) * (n_in / n_out) - 0.5
    s = np.clip(s, 0.0, n_in - 1)
    i0 = np.floor(s).astype(np.int64)
    i1 = np.minimum(i0 + 1, n_in - 1)
    lam = (s - i0).astype(np.float32)
    A = np.zeros((n_out, n_in), dtype=np.float32)
    A[np.arange(n_out), i0] += 1.0 - lam
    A[np.arange(n_out), i1] += lam
    return A


# ---------------------------------- model ------------------------------------

class PallasQValueFCN:
    """Pallas equivalent of the PyTorch Model(gamma, max_reward) forward pass."""

    def __init__(self, gamma, max_reward, key):
        self.gamma = gamma
        self.max_reward = max_reward
        self.max_possible_qvalue = max_reward * (1 + gamma / (1 - gamma))

        def init(k, shape, fan_in):
            return (jax.random.normal(k, shape, jnp.float32)
                    * (1.0 / np.sqrt(fan_in))).astype(jnp.float32)

        keys = jax.random.split(key, 4)
        c0, c1, c2 = 8, 16, 8
        # stem 3x3/s2 (3->c0), block 3x3 (c0->c1), head 3x3 (c1->c2), cls 1x1 (c2->1)
        w_stem = init(keys[0], (3, 3, 3, c0), 3 * 3 * 3)
        self.w_stem = jnp.asarray(_stem_weights_s2d(w_stem)
                                  .reshape(4 * 12, c0)).astype(jnp.bfloat16)
        self.b_stem = jnp.zeros((1, c0), jnp.float32)
        self.w_blk = init(keys[1], (9, c0, c1), 9 * c0).reshape(9 * c0, c1).astype(jnp.bfloat16)
        self.b_blk = jnp.zeros((1, c1), jnp.float32)
        self.w_h1 = init(keys[2], (9, c1, c2), 9 * c1).reshape(9 * c1, c2).astype(jnp.bfloat16)
        self.b_h1 = jnp.zeros((1, c2), jnp.float32)
        self.w_cls = init(keys[3], (1, c2), c2)                      # f32, VPU path
        self.b_cls = jnp.zeros((1, 1), jnp.float32)

        self._forward = jax.jit(self._forward_impl)

    def _forward_impl(self, x_nchw):
        x = jnp.transpose(x_nchw, (0, 2, 3, 1)).astype(jnp.float32)  # NCHW -> NHWC
        n, h, w, _ = x.shape
        assert h % 2 == 0 and w % 2 == 0

        # one-shot XLA glue on the tiny raw input (see TODO at top of file):
        # pad-by-1 + space-to-depth turns the 3x3/s2 stem into a 2x2/s1 conv.
        xp = jnp.pad(x, ((0, 0), (1, 1), (1, 1), (0, 0)))
        xs = jnp.concatenate(
            [xp[:, 0::2, 0::2, :], xp[:, 0::2, 1::2, :],
             xp[:, 1::2, 0::2, :], xp[:, 1::2, 1::2, :]], axis=-1)   # (N, H/2+1, W/2+1, 12)

        ho, wo = h // 2, w // 2
        ah = _bilinear_matrix(ho, h)                                 # (H, Ho)
        aw = _bilinear_matrix(wo, w)                                 # (W, Wo)
        m_up_t = jnp.asarray(np.ascontiguousarray(np.kron(ah, aw).T))  # (Ho*Wo, H*W)

        return _fused_forward(xs, self.w_stem, self.b_stem,
                              self.w_blk, self.b_blk, self.w_h1, self.b_h1,
                              self.w_cls, self.b_cls, m_up_t,
                              self.max_possible_qvalue)              # (N, H*W)

    def __call__(self, x_nchw):
        # mirrors the np.ndarray path: a 3-D input gets a batch dim and the
        # batch dim is squeezed from the output.
        squeeze_out = False
        if x_nchw.ndim == 3:
            squeeze_out = True
            x_nchw = x_nchw[None]
        y = self._forward(x_nchw)
        if squeeze_out:
            y = y[0]
        return y


if __name__ == "__main__":
    key = jax.random.PRNGKey(0)
    k_params, k_x = jax.random.split(key)

    model = PallasQValueFCN(gamma=0.9, max_reward=1.0, key=k_params)
    x = jax.random.normal(k_x, (2, 3, 16, 16), jnp.float32)   # NCHW, RGB-like input

    y = model(x)
    jax.block_until_ready(y)

    assert y.shape == (2, 16 * 16), y.shape
    assert y.dtype == jnp.float32
    assert bool(jnp.all(jnp.isfinite(y)))
    assert bool(jnp.all(y >= 0.0)) and bool(jnp.all(y <= model.max_possible_qvalue))
    print("KERNEL_OK")
</pallas_src>

<mosaic_0001>
module attributes {stable_mosaic.version = 11 : i64} {
  func.func @_fcn_fused_kernel(%arg0: i32, %arg1: memref<1x9x9x12xf32, #tpu.memory_space<vmem>>, %arg2: memref<48x8xbf16, #tpu.memory_space<vmem>>, %arg3: memref<1x8xf32, #tpu.memory_space<vmem>>, %arg4: memref<72x16xbf16, #tpu.memory_space<vmem>>, %arg5: memref<1x16xf32, #tpu.memory_space<vmem>>, %arg6: memref<144x8xbf16, #tpu.memory_space<vmem>>, %arg7: memref<1x8xf32, #tpu.memory_space<vmem>>, %arg8: memref<1x8xf32, #tpu.memory_space<vmem>>, %arg9: memref<1x1xf32, #tpu.memory_space<vmem>>, %arg10: memref<64x256xf32, #tpu.memory_space<vmem>>, %arg11: memref<1x1x256xf32, #tpu.memory_space<vmem>>) attributes {dimension_semantics = [#tpu.dimension_semantics<parallel>], iteration_bounds = array<i64: 2>, scalar_prefetch = 0 : i64, scratch_operands = 0 : i64, tpu.core_type = #tpu.core_type<tc>, window_params = [{transform_indices = @transform_0, window_bounds = array<i64: 1, 9, 9, 12>}, {pipeline_mode = #tpu.pipeline_mode<synchronous>, transform_indices = @transform_1, window_bounds = array<i64: 48, 8>}, {pipeline_mode = #tpu.pipeline_mode<synchronous>, transform_indices = @transform_2, window_bounds = array<i64: 1, 8>}, {pipeline_mode = #tpu.pipeline_mode<synchronous>, transform_indices = @transform_3, window_bounds = array<i64: 72, 16>}, {pipeline_mode = #tpu.pipeline_mode<synchronous>, transform_indices = @transform_4, window_bounds = array<i64: 1, 16>}, {pipeline_mode = #tpu.pipeline_mode<synchronous>, transform_indices = @transform_5, window_bounds = array<i64: 144, 8>}, {pipeline_mode = #tpu.pipeline_mode<synchronous>, transform_indices = @transform_6, window_bounds = array<i64: 1, 8>}, {pipeline_mode = #tpu.pipeline_mode<synchronous>, transform_indices = @transform_7, window_bounds = array<i64: 1, 8>}, {pipeline_mode = #tpu.pipeline_mode<synchronous>, transform_indices = @transform_8, window_bounds = array<i64: 1, 1>}, {pipeline_mode = #tpu.pipeline_mode<synchronous>, transform_indices = @transform_9, window_bounds = array<i64: 64, 256>}, {transform_indices = @transform_10, window_bounds = array<i64: 1, 1, 256>}]} {
    %c0 = arith.constant 0 : index
    %c0_0 = arith.constant 0 : index
    %c0_1 = arith.constant 0 : index
    %c0_2 = arith.constant 0 : index
    %0 = vector.load %arg1[%c0, %c0_0, %c0_1, %c0_2] : memref<1x9x9x12xf32, #tpu.memory_space<vmem>>, vector<1x9x9x12xf32>
    %1 = vector.shape_cast %0 : vector<1x9x9x12xf32> to vector<9x9x12xf32>
    %2 = vector.extract_strided_slice %1 {offsets = [0, 0, 0], sizes = [8, 8, 12], strides = [1, 1, 1]} : vector<9x9x12xf32> to vector<8x8x12xf32>
    %3 = vector.shape_cast %2 : vector<8x8x12xf32> to vector<64x12xf32>
    %4 = vector.extract_strided_slice %1 {offsets = [0, 1, 0], sizes = [8, 8, 12], strides = [1, 1, 1]} : vector<9x9x12xf32> to vector<8x8x12xf32>
    %5 = vector.shape_cast %4 : vector<8x8x12xf32> to vector<64x12xf32>
    %6 = vector.extract_strided_slice %1 {offsets = [1, 0, 0], sizes = [8, 8, 12], strides = [1, 1, 1]} : vector<9x9x12xf32> to vector<8x8x12xf32>
    %7 = vector.shape_cast %6 : vector<8x8x12xf32> to vector<64x12xf32>
    %8 = vector.extract_strided_slice %1 {offsets = [1, 1, 0], sizes = [8, 8, 12], strides = [1, 1, 1]} : vector<9x9x12xf32> to vector<8x8x12xf32>
    %9 = vector.shape_cast %8 : vector<8x8x12xf32> to vector<64x12xf32>
    %10 = tpu.concatenate %3, %5, %7, %9 in 1 : vector<64x12xf32>, vector<64x12xf32>, vector<64x12xf32>, vector<64x12xf32> -> vector<64x48xf32>
    %11 = arith.truncf %10 : vector<64x48xf32> to vector<64x48xbf16>
    %c0_3 = arith.constant 0 : index
    %c0_4 = arith.constant 0 : index
    %12 = vector.load %arg2[%c0_3, %c0_4] : memref<48x8xbf16, #tpu.memory_space<vmem>>, vector<48x8xbf16>
    %cst = arith.constant dense<0.000000e+00> : vector<64x8xf32>
    %13 = tpu.matmul %11, %12, %cst {dimension_numbers = #tpu.dot_dimension_numbers<[1], [0], [0], [1], [0, 0, 1, 1], [], []>} : vector<64x48xbf16>, vector<48x8xbf16>, vector<64x8xf32> -> vector<64x8xf32>
    %c0_5 = arith.constant 0 : index
    %c0_6 = arith.constant 0 : index
    %14 = vector.load %arg3[%c0_5, %c0_6] : memref<1x8xf32, #tpu.memory_space<vmem>>, vector<1x8xf32>
    %15 = vector.broadcast %14 : vector<1x8xf32> to vector<64x8xf32>
    %16 = arith.addf %13, %15 : vector<64x8xf32>
    %cst_7 = arith.constant 0.000000e+00 : f32
    %17 = vector.broadcast %cst_7 : f32 to vector<64x8xf32>
    %18 = arith.maximumf %16, %17 : vector<64x8xf32>
    %19 = vector.shape_cast %18 : vector<64x8xf32> to vector<8x8x8xf32>
    %cst_8 = arith.constant 0.000000e+00 : f32
    %20 = vector.broadcast %cst_8 : f32 to vector<1x8x8xf32>
    %21 = tpu.concatenate %20, %19, %20 in 0 : vector<1x8x8xf32>, vector<8x8x8xf32>, vector<1x8x8xf32> -> vector<10x8x8xf32>
    %cst_9 = arith.constant 0.000000e+00 : f32
    %22 = vector.broadcast %cst_9 : f32 to vector<10x1x8xf32>
    %23 = tpu.concatenate %22, %21, %22 in 1 : vector<10x1x8xf32>, vector<10x8x8xf32>, vector<10x1x8xf32> -> vector<10x10x8xf32>
    %24 = vector.extract_strided_slice %23 {offsets = [0, 0, 0], sizes = [8, 8, 8], strides = [1, 1, 1]} : vector<10x10x8xf32> to vector<8x8x8xf32>
    %25 = vector.shape_cast %24 : vector<8x8x8xf32> to vector<64x8xf32>
    %26 = vector.extract_strided_slice %23 {offsets = [0, 1, 0], sizes = [8, 8, 8], strides = [1, 1, 1]} : vector<10x10x8xf32> to vector<8x8x8xf32>
    %27 = vector.shape_cast %26 : vector<8x8x8xf32> to vector<64x8xf32>
    %28 = vector.extract_strided_slice %23 {offsets = [0, 2, 0], sizes = [8, 8, 8], strides = [1, 1, 1]} : vector<10x10x8xf32> to vector<8x8x8xf32>
    %29 = vector.shape_cast %28 : vector<8x8x8xf32> to vector<64x8xf32>
    %30 = vector.extract_strided_slice %23 {offsets = [1, 0, 0], sizes = [8, 8, 8], strides = [1, 1, 1]} : vector<10x10x8xf32> to vector<8x8x8xf32>
    %31 = vector.shape_cast %30 : vector<8x8x8xf32> to vector<64x8xf32>
    %32 = vector.extract_strided_slice %23 {offsets = [1, 1, 0], sizes = [8, 8, 8], strides = [1, 1, 1]} : vector<10x10x8xf32> to vector<8x8x8xf32>
    %33 = vector.shape_cast %32 : vector<8x8x8xf32> to vector<64x8xf32>
    %34 = vector.extract_strided_slice %23 {offsets = [1, 2, 0], sizes = [8, 8, 8], strides = [1, 1, 1]} : vector<10x10x8xf32> to vector<8x8x8xf32>
    %35 = vector.shape_cast %34 : vector<8x8x8xf32> to vector<64x8xf32>
    %36 = vector.extract_strided_slice %23 {offsets = [2, 0, 0], sizes = [8, 8, 8], strides = [1, 1, 1]} : vector<10x10x8xf32> to vector<8x8x8xf32>
    %37 = vector.shape_cast %36 : vector<8x8x8xf32> to vector<64x8xf32>
    %38 = vector.extract_strided_slice %23 {offsets = [2, 1, 0], sizes = [8, 8, 8], strides = [1, 1, 1]} : vector<10x10x8xf32> to vector<8x8x8xf32>
    %39 = vector.shape_cast %38 : vector<8x8x8xf32> to vector<64x8xf32>
    %40 = vector.extract_strided_slice %23 {offsets = [2, 2, 0], sizes = [8, 8, 8], strides = [1, 1, 1]} : vector<10x10x8xf32> to vector<8x8x8xf32>
    %41 = vector.shape_cast %40 : vector<8x8x8xf32> to vector<64x8xf32>
    %42 = tpu.concatenate %25, %27, %29, %31, %33, %35, %37, %39, %41 in 1 : vector<64x8xf32>, vector<64x8xf32>, vector<64x8xf32>, vector<64x8xf32>, vector<64x8xf32>, vector<64x8xf32>, vector<64x8xf32>, vector<64x8xf32>, vector<64x8xf32> -> vector<64x72xf32>
    %43 = arith.truncf %42 : vector<64x72xf32> to vector<64x72xbf16>
    %c0_10 = arith.constant 0 : index
    %c0_11 = arith.constant 0 : index
    %44 = vector.load %arg4[%c0_10, %c0_11] : memref<72x16xbf16, #tpu.memory_space<vmem>>, vector<72x16xbf16>
    %cst_12 = arith.constant dense<0.000000e+00> : vector<64x16xf32>
    %45 = tpu.matmul %43, %44, %cst_12 {dimension_numbers = #tpu.dot_dimension_numbers<[1], [0], [0], [1], [0, 0, 1, 1], [], []>} : vector<64x72xbf16>, vector<72x16xbf16>, vector<64x16xf32> -> vector<64x16xf32>
    %c0_13 = arith.constant 0 : index
    %c0_14 = arith.constant 0 : index
    %46 = vector.load %arg5[%c0_13, %c0_14] : memref<1x16xf32, #tpu.memory_space<vmem>>, vector<1x16xf32>
    %47 = vector.broadcast %46 : vector<1x16xf32> to vector<64x16xf32>
    %48 = arith.addf %45, %47 : vector<64x16xf32>
    %cst_15 = arith.constant 0.000000e+00 : f32
    %49 = vector.broadcast %cst_15 : f32 to vector<64x16xf32>
    %50 = arith.maximumf %48, %49 : vector<64x16xf32>
    %51 = vector.shape_cast %50 : vector<64x16xf32> to vector<8x8x16xf32>
    %cst_16 = arith.constant 0.000000e+00 : f32
    %52 = vector.broadcast %cst_16 : f32 to vector<1x8x16xf32>
    %53 = tpu.concatenate %52, %51, %52 in 0 : vector<1x8x16xf32>, vector<8x8x16xf32>, vector<1x8x16xf32> -> vector<10x8x16xf32>
    %cst_17 = arith.constant 0.000000e+00 : f32
    %54 = vector.broadcast %cst_17 : f32 to vector<10x1x16xf32>
    %55 = tpu.concatenate %54, %53, %54 in 1 : vector<10x1x16xf32>, vector<10x8x16xf32>, vector<10x1x16xf32> -> vector<10x10x16xf32>
    %56 = vector.extract_strided_slice %55 {offsets = [0, 0, 0], sizes = [8, 8, 16], strides = [1, 1, 1]} : vector<10x10x16xf32> to vector<8x8x16xf32>
    %57 = vector.shape_cast %56 : vector<8x8x16xf32> to vector<64x16xf32>
    %58 = vector.extract_strided_slice %55 {offsets = [0, 1, 0], sizes = [8, 8, 16], strides = [1, 1, 1]} : vector<10x10x16xf32> to vector<8x8x16xf32>
    %59 = vector.shape_cast %58 : vector<8x8x16xf32> to vector<64x16xf32>
    %60 = vector.extract_strided_slice %55 {offsets = [0, 2, 0], sizes = [8, 8, 16], strides = [1, 1, 1]} : vector<10x10x16xf32> to vector<8x8x16xf32>
    %61 = vector.shape_cast %60 : vector<8x8x16xf32> to vector<64x16xf32>
    %62 = vector.extract_strided_slice %55 {offsets = [1, 0, 0], sizes = [8, 8, 16], strides = [1, 1, 1]} : vector<10x10x16xf32> to vector<8x8x16xf32>
    %63 = vector.shape_cast %62 : vector<8x8x16xf32> to vector<64x16xf32>
    %64 = vector.extract_strided_slice %55 {offsets = [1, 1, 0], sizes = [8, 8, 16], strides = [1, 1, 1]} : vector<10x10x16xf32> to vector<8x8x16xf32>
    %65 = vector.shape_cast %64 : vector<8x8x16xf32> to vector<64x16xf32>
    %66 = vector.extract_strided_slice %55 {offsets = [1, 2, 0], sizes = [8, 8, 16], strides = [1, 1, 1]} : vector<10x10x16xf32> to vector<8x8x16xf32>
    %67 = vector.shape_cast %66 : vector<8x8x16xf32> to vector<64x16xf32>
    %68 = vector.extract_strided_slice %55 {offsets = [2, 0, 0], sizes = [8, 8, 16], strides = [1, 1, 1]} : vector<10x10x16xf32> to vector<8x8x16xf32>
    %69 = vector.shape_cast %68 : vector<8x8x16xf32> to vector<64x16xf32>
    %70 = vector.extract_strided_slice %55 {offsets = [2, 1, 0], sizes = [8, 8, 16], strides = [1, 1, 1]} : vector<10x10x16xf32> to vector<8x8x16xf32>
    %71 = vector.shape_cast %70 : vector<8x8x16xf32> to vector<64x16xf32>
    %72 = vector.extract_strided_slice %55 {offsets = [2, 2, 0], sizes = [8, 8, 16], strides = [1, 1, 1]} : vector<10x10x16xf32> to vector<8x8x16xf32>
    %73 = vector.shape_cast %72 : vector<8x8x16xf32> to vector<64x16xf32>
    %74 = tpu.concatenate %57, %59, %61, %63, %65, %67, %69, %71, %73 in 1 : vector<64x16xf32>, vector<64x16xf32>, vector<64x16xf32>, vector<64x16xf32>, vector<64x16xf32>, vector<64x16xf32>, vector<64x16xf32>, vector<64x16xf32>, vector<64x16xf32> -> vector<64x144xf32>
    %75 = arith.truncf %74 : vector<64x144xf32> to vector<64x144xbf16>
    %c0_18 = arith.constant 0 : index
    %c0_19 = arith.constant 0 : index
    %76 = vector.load %arg6[%c0_18, %c0_19] : memref<144x8xbf16, #tpu.memory_space<vmem>>, vector<144x8xbf16>
    %cst_20 = arith.constant dense<0.000000e+00> : vector<64x8xf32>
    %77 = tpu.matmul %75, %76, %cst_20 {dimension_numbers = #tpu.dot_dimension_numbers<[1], [0], [0], [1], [0, 0, 1, 1], [], []>} : vector<64x144xbf16>, vector<144x8xbf16>, vector<64x8xf32> -> vector<64x8xf32>
    %c0_21 = arith.constant 0 : index
    %c0_22 = arith.constant 0 : index
    %78 = vector.load %arg7[%c0_21, %c0_22] : memref<1x8xf32, #tpu.memory_space<vmem>>, vector<1x8xf32>
    %79 = vector.broadcast %78 : vector<1x8xf32> to vector<64x8xf32>
    %80 = arith.addf %77, %79 : vector<64x8xf32>
    %cst_23 = arith.constant 0.000000e+00 : f32
    %81 = vector.broadcast %cst_23 : f32 to vector<64x8xf32>
    %82 = arith.maximumf %80, %81 : vector<64x8xf32>
    %c0_24 = arith.constant 0 : index
    %c0_25 = arith.constant 0 : index
    %83 = vector.load %arg8[%c0_24, %c0_25] : memref<1x8xf32, #tpu.memory_space<vmem>>, vector<1x8xf32>
    %84 = vector.broadcast %83 : vector<1x8xf32> to vector<64x8xf32>
    %85 = arith.mulf %82, %84 : vector<64x8xf32>
    %cst_26 = arith.constant dense<0.000000e+00> : vector<64xf32>
    %86 = vector.multi_reduction <add>, %85, %cst_26 [1] : vector<64x8xf32> to vector<64xf32>
    %87 = vector.shape_cast %86 : vector<64xf32> to vector<64x1xf32>
    %c0_27 = arith.constant 0 : index
    %c0_28 = arith.constant 0 : index
    %88 = vector.load %arg9[%c0_27, %c0_28] : memref<1x1xf32, #tpu.memory_space<vmem>>, vector<1x1xf32>
    %89 = vector.broadcast %88 : vector<1x1xf32> to vector<64x1xf32>
    %90 = arith.addf %87, %89 : vector<64x1xf32>
    %c0_29 = arith.constant 0 : index
    %c0_30 = arith.constant 0 : index
    %91 = vector.load %arg10[%c0_29, %c0_30] : memref<64x256xf32, #tpu.memory_space<vmem>>, vector<64x256xf32>
    %cst_31 = arith.constant dense<0.000000e+00> : vector<1x256xf32>
    %92 = tpu.matmul %90, %91, %cst_31 {dimension_numbers = #tpu.dot_dimension_numbers<[0], [0], [1], [1], [0, 1, 1, 1], [], []>} : vector<64x1xf32>, vector<64x256xf32>, vector<1x256xf32> -> vector<1x256xf32>
    %93 = arith.negf %92 : vector<1x256xf32>
    %94 = math.exp %93 : vector<1x256xf32>
    %cst_32 = arith.constant 1.000000e+00 : f32
    %95 = vector.broadcast %cst_32 : f32 to vector<1x256xf32>
    %96 = arith.addf %95, %94 : vector<1x256xf32>
    %97 = arith.divf %95, %96 : vector<1x256xf32>
    %cst_33 = arith.constant 1.000000e+01 : f32
    %98 = vector.broadcast %cst_33 : f32 to vector<1x256xf32>
    %99 = arith.mulf %98, %97 : vector<1x256xf32>
    %c0_34 = arith.constant 0 : index
    %c0_35 = arith.constant 0 : index
    %c0_36 = arith.constant 0 : index
    %100 = vector.load %arg11[%c0_34, %c0_35, %c0_36] : memref<1x1x256xf32, #tpu.memory_space<vmem>>, vector<1x1x256xf32>
    %101 = vector.shape_cast %100 : vector<1x1x256xf32> to vector<1x256xf32>
    %102 = vector.shape_cast %99 : vector<1x256xf32> to vector<1x1x256xf32>
    tpu.vector_store %arg11[%c0_34, %c0_35, %c0_36], %102 {strides = array<i32>} : memref<1x1x256xf32, #tpu.memory_space<vmem>>, vector<1x1x256xf32>,
    return
  }
  func.func @transform_0(%arg0: i32) -> (i32, i32, i32, i32) {
    %c0_i32 = arith.constant 0 : i32
    %c0_i32_0 = arith.constant 0 : i32
    %c0_i32_1 = arith.constant 0 : i32
    %c0_i32_2 = arith.constant 0 : i32
    return %arg0, %c0_i32, %c0_i32_0, %c0_i32_1 : i32, i32, i32, i32
  }
  func.func @transform_1(%arg0: i32) -> (i32, i32) {
    %c0_i32 = arith.constant 0 : i32
    %c0_i32_0 = arith.constant 0 : i32
    %c0_i32_1 = arith.constant 0 : i32
    return %c0_i32, %c0_i32_0 : i32, i32
  }
  func.func @transform_2(%arg0: i32) -> (i32, i32) {
    %c0_i32 = arith.constant 0 : i32
    %c0_i32_0 = arith.constant 0 : i32
    %c0_i32_1 = arith.constant 0 : i32
    return %c0_i32, %c0_i32_0 : i32, i32
  }
  func.func @transform_3(%arg0: i32) -> (i32, i32) {
    %c0_i32 = arith.constant 0 : i32
    %c0_i32_0 = arith.constant 0 : i32
    %c0_i32_1 = arith.constant 0 : i32
    return %c0_i32, %c0_i32_0 : i32, i32
  }
  func.func @transform_4(%arg0: i32) -> (i32, i32) {
    %c0_i32 = arith.constant 0 : i32
    %c0_i32_0 = arith.constant 0 : i32
    %c0_i32_1 = arith.constant 0 : i32
    return %c0_i32, %c0_i32_0 : i32, i32
  }
  func.func @transform_5(%arg0: i32) -> (i32, i32) {
    %c0_i32 = arith.constant 0 : i32
    %c0_i32_0 = arith.constant 0 : i32
    %c0_i32_1 = arith.constant 0 : i32
    return %c0_i32, %c0_i32_0 : i32, i32
  }
  func.func @transform_6(%arg0: i32) -> (i32, i32) {
    %c0_i32 = arith.constant 0 : i32
    %c0_i32_0 = arith.constant 0 : i32
    %c0_i32_1 = arith.constant 0 : i32
    return %c0_i32, %c0_i32_0 : i32, i32
  }
  func.func @transform_7(%arg0: i32) -> (i32, i32) {
    %c0_i32 = arith.constant 0 : i32
    %c0_i32_0 = arith.constant 0 : i32
    %c0_i32_1 = arith.constant 0 : i32
    return %c0_i32, %c0_i32_0 : i32, i32
  }
  func.func @transform_8(%arg0: i32) -> (i32, i32) {
    %c0_i32 = arith.constant 0 : i32
    %c0_i32_0 = arith.constant 0 : i32
    %c0_i32_1 = arith.constant 0 : i32
    return %c0_i32, %c0_i32_0 : i32, i32
  }
  func.func @transform_9(%arg0: i32) -> (i32, i32) {
    %c0_i32 = arith.constant 0 : i32
    %c0_i32_0 = arith.constant 0 : i32
    %c0_i32_1 = arith.constant 0 : i32
    return %c0_i32, %c0_i32_0 : i32, i32
  }
  func.func @transform_10(%arg0: i32) -> (i32, i32, i32) {
    %c0_i32 = arith.constant 0 : i32
    %c0_i32_0 = arith.constant 0 : i32
    %c0_i32_1 = arith.constant 0 : i32
    return %arg0, %c0_i32, %c0_i32_0 : i32, i32, i32
  }
}

</mosaic_0001>

<bundles_post_ra>
// kernel: _forward_impl.1
= control target key start
LH: loop header
LB: loop body
LE: loop exit
PB: predicated region body
PF: predicated region fallthrough
CT: control target
= control target key end

     0   :  { %s2527_s15 = smov 0   ;;  %s3253_s0 = inlined_call_operand.vmem [shape: f32[2,9,9,12], index: 0, kind: input, shape index: {}]   ;;  %s3254_s1 = inlined_call_operand.vmem [shape: bf16[48,8], index: 1, kind: input, shape index: {}]   ;;  %s3255_s2 = inlined_call_operand.vmem [shape: f32[1,8], index: 2, kind: input, shape index: {}, may-alias: {2,6}]   ;;  %s3256_s3 = inlined_call_operand.vmem [shape: bf16[72,16], index: 3, kind: input, shape index: {}]   ;;  %s3257_s4 = inlined_call_operand.vmem [shape: f32[1,16], index: 4, kind: input, shape index: {}]   ;;  %s3258_s5 = inlined_call_operand.vmem [shape: bf16[144,8], index: 5, kind: input, shape index: {}]   ;;  %s3259_s6 = inlined_call_operand.vmem [shape: f32[1,8], index: 6, kind: input, shape index: {}, may-alias: {2,6}]   ;;  %s3260_s7 = inlined_call_operand.vmem [shape: f32[1,8], index: 7, kind: input, shape index: {}]   ;;  %s3261_s8 = inlined_call_operand.<no memory space> [shape: f32[1,1], index: 8, kind: input, shape index: {}]   ;;  %s3262_s9 = inlined_call_operand.vmem [shape: f32[64,256], index: 9, kind: input, shape index: {}]   ;;  %s3263_s10 = inlined_call_operand.vmem [shape: f32[2,1,256], index: 10, kind: output, shape index: {}]  }
   0x1   :  { %v15_v0 = vstv %s3261_s8 }
   0x2   :  { %16 = vst [vmem:[#allocation2] sm:$0x1] %v15_v0 }
   0x3 LB: > { %s1940_s16 = sadd.s32 4294967295, %s2451_s15   ;;  %p1944_p0 = scmp.ge.s32.totalorder %s2451_s15, 1  ;;  %s2451_s15 = sphi %s2527_s15, %s22_s15  }
   0x4   : > { %p314_p1 = scmp.lt.s32.totalorder %s2451_s15, 3 }
   0x6   : > { %p315_p2 = pnand %p1944_p0, %p314_p1 }
   0x7   : > { %p351_p3 = scmp.lt.s32.totalorder (!%p315_p2), %s1940_s16, 1  ;;  %s2453_s24 = smov (!%p315_p2), 24  }
   0x8   : > { %318 = sbr.rel (%p315_p2) target bundleno = 1573 (0x625), region = 60  ;;  %s2454_s27 = smov (!%p315_p2), 12  }
   0x9   : > { %s2455_s28 = smov (!%p315_p2), 36   ;;  %s2457_s11 = smov (!%p315_p2), 8  }
   0xa   : > { %s2458_s12 = smov (!%p315_p2), 32   ;;  %s2459_s13 = smov (!%p315_p2), 16  }
   0xb   : > { %s2460_s14 = smov (!%p315_p2), 40   ;;  %s2461_s8 = smov (!%p315_p2), 48  }
   0xc   : > { %s2462_s23 = smov (!%p315_p2), 56   ;;  %s2466_s19 = smov (!%p315_p2), 80  }
   0xd   : > { %s3265_s16 = smov (!%p351_p3, %s1940_s16), 1  ;;  %v2420_v1 = vld [vmem:[%s3254_s1 + $0x10] sm:$0xff]   ;;  %v2421_v2 = vld [vmem:[%s3254_s1 + $0x8] sm:$0xff]   ;;  %vm395_vm0 = vcmask 1046528   ;;  %v2422_v42 = vld [vmem:[%s3254_s1] sm:$0xff]   ;;  %vm497_vm1 = vcmask 97280  }
   0xe   : > { %s2035_s18 = smul.u32 144, %s3265_s16  ;;  %2002 = vmatprep.subr.bf16.mxu1 %v2420_v1  ;;  %vm506_vm2 = vcmask 195584   ;;  %vm515_vm3 = vcmask 293888   ;;  %vm559_vm4 = vcmask 392192   ;;  %vm672_vm5 = vcmask 1040384   ;;  %s2467_s20 = smov 112  }
   0xf   : > { %2003 = vmatpush3.bf16.msra.mxu1 %v2420_v1  ;;  %vm731_vm6 = vcmask 1045504   ;;  %vm1086_vm7 = vcmask 1043456   ;;  %vm956_vm8 = vcmask 64512   ;;  %vm965_vm9 = vcmask 130048  }
  0x10   : > { %s2544_s21 = scalar_lea.vmem %s3253_s0, %s2035_s18  ;;  %2004 = vmatprep.subr.bf16.mxu1 %v2421_v2  ;;  %vm982_vm10 = vcmask 261120   ;;  %vm991_vm11 = vcmask 326656   ;;  %vm1008_vm12 = vcmask 457728   ;;  %vm1017_vm13 = vcmask 523264  }
  0x11   : > { %v2550_v3 = vld [vmem:[%s2544_s21 + $0x10] sm:$0xff]  ;;  %v2553_v4 = vld [vmem:[%s2544_s21 + $0x20] sm:$0xff]  ;;  %v364_v5 = vld [vmem:[%s2544_s21 + $0x18] sm:$0x1]  ;;  %vm1073_vm14 = vcmask 588800   ;;  %vm1475_vm15 = vcmask 654336  }
  0x12   : > { %v402_v6 = vrot.slane %v2553_v4, 1  ;;  %v2060_v7 = vpack.i.bf16 %v2553_v4, %v2550_v3  ;;  %v399_v8 = vrot.slane %v2550_v3, 1  ;;  %v366_v9 = vld [vmem:[%s2544_s21 + $0x28] sm:$0x1]  ;;  %v400_v10 = vrot.slane %v364_v5, 1  ;;  %v2562_v11 = vld [vmem:[%s2544_s21] sm:$0xff] }
  0x13   : > { %v403_v12 = vrot.slane %v366_v9, 1  ;;  %v362_v13 = vld [vmem:[%s2544_s21 + $0x8] sm:$0x1]  ;;  %v396_v14 = vrot.slane %v2562_v11, 1  ;;  %v2567_v15 = vld [vmem:[%s2544_s21 + $0x30] sm:$0xff]  ;;  %v2570_v16 = vld [vmem:[%s2544_s21 + $0x40] sm:$0xff]  ;;  %2005 = vmatpush3.bf16.msra.mxu1 %v2421_v2 }
  0x14   : > { %2061 = vrot.lane.b32.xlu1 %v2060_v7, %s2453_s24  ;;  %v401_v17 = vsel %vm395_vm0, %v399_v8, %v400_v10  ;;  %v397_v18 = vrot.slane %v362_v13, 1  ;;  %v408_v19 = vrot.slane %v2570_v16, 1  ;;  %v2065_v20 = vpack.i.bf16 %v2570_v16, %v2567_v15  ;;  %v368_v21 = vld [vmem:[%s2544_s21 + $0x38] sm:$0x1]  ;;  %v370_v22 = vld [vmem:[%s2544_s21 + $0x48] sm:$0x1]  ;;  %2006 = vmatprep.subr.bf16.mxu1 %v2422_v42 }
  0x15   : > { %v405_v23 = vrot.slane %v2567_v15, 1  ;;  %v406_v24 = vrot.slane %v368_v21, 1  ;;  %v409_v25 = vrot.slane %v370_v22, 1  ;;  %v2581_v26 = vld [vmem:[%s2544_s21 + $0x50] sm:$0xff]  ;;  %v372_v27 = vld [vmem:[%s2544_s21 + $0x58] sm:$0x1]  ;;  %v404_v28 = vsel %vm395_vm0, %v402_v6, %v403_v12 }
  0x16   : > { %v398_v29 = vsel %vm395_vm0, %v396_v14, %v397_v18  ;;  %v2587_v30 = vld [vmem:[%s2544_s21 + $0x60] sm:$0xff]  ;;  %v374_v31 = vld [vmem:[%s2544_s21 + $0x68] sm:$0x1]  ;;  %v2591_v32 = vld [vmem:[%s2544_s21 + $0x70] sm:$0xff]  ;;  %v411_v46 = vrot.slane %v2581_v26, 1  ;;  %v412_v47 = vrot.slane %v372_v27, 1  ;;  %v2080_v53 = vpack.i.bf16 %v404_v28, %v401_v17 }
  0x17   : > { %v2070_v33 = vpack.i.bf16 %v401_v17, %v398_v29  ;;  %v407_v34 = vsel %vm395_vm0, %v405_v23, %v406_v24  ;;  %v410_v35 = vsel %vm395_vm0, %v408_v19, %v409_v25  ;;  %v376_v36 = vld [vmem:[%s2544_s21 + $0x78] sm:$0x1]  ;;  %v414_v37 = vrot.slane %v2587_v30, 1  ;;  %v377_v38 = vld [vmem:[%s2544_s21 + $0x80] sm:$0xff]  ;;  %v378_v39 = vld [vmem:[%s2544_s21 + $0x88] sm:$0x1]  ;;  %2007 = vmatpush3.bf16.msra.mxu1 %v2422_v42 }
  0x18   : > { %2066 = vrot.lane.b32.xlu1 %v2065_v20, %s2453_s24  ;;  %v2085_v40 = vpack.i.bf16 %v410_v35, %v407_v34  ;;  %v415_v41 = vrot.slane %v374_v31, 1  ;;  %v2075_v43 = vpack.i.bf16 %v407_v34, %v404_v28  ;;  %v417_v44 = vrot.slane %v2591_v32, 1 }
  0x19   : > { %2071 = vrot.lane.b32.xlu0 %v2070_v33, %s2454_s27  ;;  %v418_v45 = vrot.slane %v376_v36, 1  ;;  %v422_v50 = vrot.slane %v377_v38, 1  ;;  %v423_v51 = vrot.slane %v378_v39, 1  ;;  %v413_v54 = vsel %vm395_vm0, %v411_v46, %v412_v47 }
  0x1a   : > { %v416_v48 = vsel %vm395_vm0, %v414_v37, %v415_v41  ;;  %v2105_v55 = vpack.i.bf16 %v377_v38, %v2591_v32  ;;  %v2090_v56 = vpack.i.bf16 %v413_v54, %v410_v35  ;;  %v2100_v59 = vpack.i.bf16 %v2587_v30, %v2581_v26 }
  0x1b   : > { %v419_v49 = vsel %vm395_vm0, %v417_v44, %v418_v45  ;;  %v424_v57 = vsel %vm395_vm0, %v422_v50, %v423_v51  ;;  %v2110_v60 = vpack.i.bf16 %v416_v48, %v413_v54 }
  0x1c   : > { %2086 = vrot.lane.b32.xlu1 %v2085_v40, %s2455_s28  ;;  %v2095_v52 = vpack.i.bf16 %v419_v49, %v416_v48  ;;  %v2115_v58 = vpack.i.bf16 %v424_v57, %v419_v49 }
  0x1d   : > { %2076 = vrot.lane.b32.xlu0 %v2075_v43, %s2454_s27 }
  0x20   : > { %2096 = vrot.lane.b32.xlu1 %v2095_v52, %s2454_s27 }
  0x21   : > { %2081 = vrot.lane.b32.xlu0 %v2080_v53, %s2455_s28 }
  0x24   : > { %2106 = vrot.lane.b32.xlu1 %v2105_v55, %s2453_s24 }
  0x25   : > { %2091 = vrot.lane.b32.xlu0 %v2090_v56, %s2454_s27  ;;  %s2463_s27 = smov 64  }
  0x28   : > { %2116 = vrot.lane.b32.xlu1 %v2115_v58, %s2455_s28 }
  0x29   : > { %2101 = vrot.lane.b32.xlu0 %v2100_v59, %s2453_s24 }
  0x2d   : > { %2111 = vrot.lane.b32.xlu0 %v2110_v60, %s2455_s28 }
  0x86   : > { %v2062_v61 = vpop.permute.xlu1 %2061 }
  0x87   : > { %v2064_v13 = vunpack.i.h.bf16 %v2062_v61  ;;  %v2063_v14 = vunpack.i.l.bf16 %v2062_v61 }
  0x8a   : > { %v2067_v62 = vpop.permute.xlu1 %2066 }
  0x8b   : > { %v2072_v63 = vpop.permute.xlu0 %2071  ;;  %v2069_v5 = vunpack.i.h.bf16 %v2067_v62  ;;  %v2068_v6 = vunpack.i.l.bf16 %v2067_v62  ;;  %v2456_v62 = vmov 0.0  }
  0x8c   : > { %v2074_v0 = vunpack.i.h.bf16 %v2072_v63  ;;  %v2073_v1 = vunpack.i.l.bf16 %v2072_v63  ;;  %v654_v63 = vrot.slane %v2456_v62, 7 }
  0x8e   : > { %v2087_v2 = vpop.permute.xlu1 %2086  ;;  %v499_v17 = vsel %vm497_vm1, %v2550_v3, %v2074_v0  ;;  %v498_v18 = vsel %vm497_vm1, %v2562_v11, %v2073_v1 }
  0x8f   : > { %v2077_v7 = vpop.permute.xlu0 %2076  ;;  %v2089_v10 = vunpack.i.h.bf16 %v2087_v2  ;;  %v2088_v12 = vunpack.i.l.bf16 %v2087_v2  ;;  %v507_v31 = vsel %vm506_vm2, %v498_v18, %v2063_v14 }
  0x90   : > { %v2079_v8 = vunpack.i.h.bf16 %v2077_v7  ;;  %v2078_v9 = vunpack.i.l.bf16 %v2077_v7  ;;  %v2659_v7 = vsel %vm672_vm5, 0.0, %v654_v63 }
  0x92   : > { %v501_v19 = vsel %vm497_vm1, %v2567_v15, %v2079_v8  ;;  %v500_v20 = vsel %vm497_vm1, %v2553_v4, %v2078_v9  ;;  %v2097_v21 = vpop.permute.xlu1 %2096  ;;  %v508_v15 = vsel %vm506_vm2, %v499_v17, %v2064_v13  ;;  %v682_v8 = vsel %vm672_vm5, %v654_v63, 0.0 }
  0x93   : > { %v509_v22 = vsel %vm506_vm2, %v500_v20, %v2068_v6  ;;  %v510_v23 = vsel %vm506_vm2, %v501_v19, %v2069_v5  ;;  %v2082_v24 = vpop.permute.xlu0 %2081  ;;  %v2099_v25 = vunpack.i.h.bf16 %v2097_v21  ;;  %v2098_v27 = vunpack.i.l.bf16 %v2097_v21 }
  0x94   : > { %v518_v28 = vsel %vm515_vm3, %v509_v22, %v2088_v12  ;;  %v519_v3 = vsel %vm515_vm3, %v510_v23, %v2089_v10  ;;  %v2084_v29 = vunpack.i.h.bf16 %v2082_v24  ;;  %v2083_v11 = vunpack.i.l.bf16 %v2082_v24 }
  0x95   : > { %v525_v35 = vpack.c.bf16 %v519_v3, %v518_v28  ;;  %v505_v42 = vsel %vm497_vm1, %v2591_v32, %v2099_v25  ;;  %v504_v43 = vsel %vm497_vm1, %v2587_v30, %v2098_v27  ;;  %v707_v17 = vrot.slane %v2659_v7, 1 }
  0x96   : > { %v516_v4 = vsel %vm515_vm3, %v507_v31, %v2083_v11  ;;  %v517_v33 = vsel %vm515_vm3, %v508_v15, %v2084_v29  ;;  %v2107_v34 = vpop.permute.xlu1 %2106  ;;  %v708_v18 = vrot.slane %v682_v8, 1  ;;  %v732_v23 = vrot.slane %v2659_v7, 2 }
  0x97   : > { %v2092_v36 = vpop.permute.xlu0 %2091  ;;  %v524_v37 = vpack.c.bf16 %v517_v33, %v516_v4  ;;  %v2109_v38 = vunpack.i.h.bf16 %v2107_v34  ;;  %v2108_v39 = vunpack.i.l.bf16 %v2107_v34  ;;  %v733_v24 = vrot.slane %v682_v8, 2 }
  0x98   : > { %v2094_v40 = vunpack.i.h.bf16 %v2092_v36  ;;  %v2093_v41 = vunpack.i.l.bf16 %v2092_v36  ;;  %v2677_v15 = vsel %vm395_vm0, %v707_v17, %v708_v18 }
  0x99   : > { %2008 = vmatprep.mubr.msk.bf16.mxu1 %vm559_vm4, %v524_v37  ;;  %v513_v46 = vsel %vm506_vm2, %v504_v43, %v2108_v39  ;;  %v514_v47 = vsel %vm506_vm2, %v505_v42, %v2109_v38 }
  0x9a   : > { %2009 = vmatmul.mubr.msk.bf16.vlgmr.msra.gmra.mxu1 %vm559_vm4, %v525_v35  ;;  %v2117_v44 = vpop.permute.xlu1 %2116  ;;  %v503_v50 = vsel %vm497_vm1, %v2581_v26, %v2094_v40  ;;  %v502_v32 = vsel %vm497_vm1, %v2570_v16, %v2093_v41  ;;  %v2653_v16 = vld [vmem:[%s3255_s2] ss:$0 sm:$0xff]  ;;  %vm1493_vm1 = vcmask 916480  }
  0x9b   : > { %v2102_v45 = vpop.permute.xlu0 %2101  ;;  %v2119_v48 = vunpack.i.h.bf16 %v2117_v44  ;;  %v2118_v49 = vunpack.i.l.bf16 %v2117_v44 }
  0x9c   : > { %v2104_v51 = vunpack.i.h.bf16 %v2102_v45  ;;  %v2103_v30 = vunpack.i.l.bf16 %v2102_v45 }
  0x9d   : > { %v522_v55 = vsel %vm515_vm3, %v513_v46, %v2118_v49  ;;  %v523_v56 = vsel %vm515_vm3, %v514_v47, %v2119_v48  ;;  %v2694_v46 = vsel %vm731_vm6, %v732_v23, %v733_v24  ;;  %v2423_v24 = vld [vmem:[%s3256_s3 + $0x20] ss:$0 sps:$4 sm:$0xff]  }
  0x9e   : > { %v511_v52 = vsel %vm506_vm2, %v502_v32, %v2103_v30  ;;  %v512_v53 = vsel %vm506_vm2, %v503_v50, %v2104_v51  ;;  %v527_v60 = vpack.c.bf16 %v523_v56, %v522_v55  ;;  %2034 = vmatprep.subr.msk.bf16.mxu1 %vm1086_vm7, %v2423_v24 }
  0x9f   : > { %v2112_v54 = vpop.permute.xlu0 %2111 }
  0xa0   : > { %v2114_v57 = vunpack.i.h.bf16 %v2112_v54  ;;  %v2113_v58 = vunpack.i.l.bf16 %v2112_v54 }
  0xa2   : > { %v520_v59 = vsel %vm515_vm3, %v511_v52, %v2113_v58  ;;  %v521_v26 = vsel %vm515_vm3, %v512_v53, %v2114_v57 }
  0xa3   : > { %v526_v61 = vpack.c.bf16 %v521_v26, %v520_v59 }
  0xa5   : > { %2012 = vmatprep.mubr.msk.bf16.mxu1 %vm559_vm4, %v526_v61 }
  0xa6   : > { %2013 = vmatmul.mubr.msk.bf16.gmra.mxu1 %vm559_vm4, %v527_v60 }
 0x15a   : > { %v2010_v0 = vpop.f32.mrf.mxu1 }
 0x15b   : > { %v615_v1 = vadd.f32 %v2010_v0, %v2653_v16 }
 0x15c   : > { %v606_v2 = vpop.f32.mrf.mxu1 }
 0x15d   : > { %v639_v5 = vmax.f32 %v615_v1, 0.0  ;;  %v607_v6 = vadd.f32 %v2653_v16, %v606_v2 }
 0x15e   : > { %v2011_v9 = vpop.f32.mrf.mxu1 }
 0x15f   : > { %v657_v10 = vrot.slane %v639_v5, 7  ;;  %v637_v12 = vmax.f32 %v607_v6, 0.0  ;;  %v618_v13 = vadd.f32 %v2011_v9, %v2653_v16 }
 0x160   : > { %v609_v14 = vpop.f32.mrf.mxu1 }
 0x161   : > { %v655_v19 = vrot.slane %v637_v12, 7  ;;  %v640_v20 = vmax.f32 %v618_v13, 0.0  ;;  %v2665_v21 = vsel %vm672_vm5, 0.0, %v657_v10  ;;  %v685_v22 = vsel %vm672_vm5, %v657_v10, 0.0 }
 0x162   : > { %v610_v3 = vadd.f32 %v2653_v16, %v609_v14  ;;  %v716_v36 = vrot.slane %v2665_v21, 1  ;;  %v717_v37 = vrot.slane %v685_v22, 1  ;;  %v741_v53 = vrot.slane %v2665_v21, 2 }
 0x163   : > { %v2670_v25 = vsel %vm672_vm5, 0.0, %v655_v19  ;;  %v683_v27 = vsel %vm672_vm5, %v655_v19, 0.0  ;;  %v658_v28 = vrot.slane %v640_v20, 7  ;;  %v742_v54 = vrot.slane %v685_v22, 2 }
 0x164   : > { %v710_v29 = vrot.slane %v2670_v25, 1  ;;  %v711_v11 = vrot.slane %v683_v27, 1  ;;  %v735_v31 = vrot.slane %v2670_v25, 2  ;;  %v736_v4 = vrot.slane %v683_v27, 2 }
 0x165   : > { %v2680_v33 = vsel %vm672_vm5, 0.0, %v658_v28  ;;  %v686_v34 = vsel %vm672_vm5, %v658_v28, 0.0  ;;  %v638_v35 = vmax.f32 %v610_v3, 0.0  ;;  %v718_v50 = vsel %vm395_vm0, %v716_v36, %v717_v37  ;;  %v2424_v3 = vld [vmem:[%s3256_s3 + $0x18] sm:$0xff]  }
 0x166   : > { %v719_v38 = vrot.slane %v2680_v33, 1  ;;  %v720_v39 = vrot.slane %v686_v34, 1  ;;  %v2014_v41 = vpop.f32.mrf.mxu1  ;;  %v2120_v42 = vpack.i.bf16 %v2680_v33, %v2665_v21  ;;  %v712_v43 = vsel %vm395_vm0, %v710_v29, %v711_v11 }
 0x167   : > { %v656_v40 = vrot.slane %v638_v35, 7  ;;  %v2125_v44 = vpack.i.bf16 %v712_v43, %v2677_v15  ;;  %v737_v47 = vsel %vm731_vm6, %v735_v31, %v736_v4  ;;  %v744_v48 = vrot.slane %v2680_v33, 2 }
 0x168   : > { %v2690_v45 = vsel %vm395_vm0, %v719_v38, %v720_v39  ;;  %2121 = vrot.lane.b32.xlu1 %v2120_v42, %s2453_s24  ;;  %v745_v49 = vrot.slane %v686_v34, 2  ;;  %v622_v30 = vpop.f32.mrf.mxu1  ;;  %v2130_v55 = vpack.i.bf16 %v737_v47, %v2694_v46  ;;  %v743_v60 = vsel %vm731_vm6, %v741_v53, %v742_v54  ;;  %v2425_v39 = vld [vmem:[%s3256_s3 + $0x10] sm:$0xff]  }
 0x169   : > { %2126 = vrot.lane.b32.xlu0 %v2125_v44, %s2457_s11  ;;  %v2701_v32 = vsel %vm672_vm5, 0.0, %v656_v40  ;;  %v684_v51 = vsel %vm672_vm5, %v656_v40, 0.0  ;;  %v2145_v52 = vpack.i.bf16 %v2690_v45, %v718_v50  ;;  %v623_v58 = vadd.f32 %v2653_v16, %v622_v30  ;;  %v2426_v44 = vld [vmem:[%s3256_s3 + $0x8] sm:$0xff]   ;;  %v2427_v30 = vld [vmem:[%s3256_s3] sm:$0xff]  }
 0x16a   : > { %v713_v56 = vrot.slane %v2701_v32, 1  ;;  %v714_v57 = vrot.slane %v684_v51, 1  ;;  %v2712_v59 = vsel %vm731_vm6, %v744_v48, %v745_v49  ;;  %v2015_v26 = vpop.f32.mrf.mxu1  ;;  %v2135_v61 = vpack.i.bf16 %v2701_v32, %v2670_v25 }
 0x16b   : > { %v738_v63 = vrot.slane %v2701_v32, 2  ;;  %v631_v0 = vadd.f32 %v2014_v41, %v2653_v16  ;;  %v2150_v1 = vpack.i.bf16 %v2712_v59, %v743_v60  ;;  %v739_v2 = vrot.slane %v684_v51, 2 }
 0x16c   : > { %2146 = vrot.lane.b32.xlu1 %v2145_v52, %s2458_s12  ;;  %v641_v5 = vmax.f32 %v623_v58, 0.0  ;;  %v634_v6 = vadd.f32 %v2015_v26, %v2653_v16  ;;  %v715_v8 = vsel %vm395_vm0, %v713_v56, %v714_v57  ;;  %v2140_v9 = vpack.i.bf16 %v2665_v21, %v2701_v32  ;;  %v625_v4 = vpop.f32.mrf.mxu1 }
 0x16d   : > { %2131 = vrot.lane.b32.xlu0 %v2130_v55, %s2459_s13  ;;  %v2155_v10 = vpack.i.bf16 %v718_v50, %v715_v8  ;;  %v643_v12 = vmax.f32 %v631_v0, 0.0  ;;  %v740_v17 = vsel %vm731_vm6, %v738_v63, %v739_v2  ;;  %v2165_v18 = vpack.i.bf16 %v715_v8, %v712_v43 }
 0x16e   : > { %v659_v13 = vrot.slane %v641_v5, 7  ;;  %v644_v14 = vmax.f32 %v634_v6, 0.0  ;;  %v2160_v19 = vpack.i.bf16 %v743_v60, %v740_v17  ;;  %v2170_v27 = vpack.i.bf16 %v740_v17, %v737_v47 }
 0x16f   : > { %v661_v20 = vrot.slane %v643_v12, 7  ;;  %v1088_v34 = vsel %vm1086_vm7, %v2423_v24, 0  ;;  %v626_v37 = vadd.f32 %v2653_v16, %v625_v4 }
 0x170   : > { %2151 = vrot.lane.b32.xlu1 %v2150_v1, %s2460_s14  ;;  %v2730_v22 = vsel %vm672_vm5, 0.0, %v659_v13  ;;  %v662_v23 = vrot.slane %v644_v14, 7  ;;  %v687_v11 = vsel %vm672_vm5, %v659_v13, 0.0  ;;  %2017 = vmatpush3.bf16.msra.mxu1 %v1088_v34 }
 0x171   : > { %2136 = vrot.lane.b32.xlu0 %v2135_v61, %s2453_s24  ;;  %v2185_v28 = vpack.i.bf16 %v2730_v22, %v2680_v33  ;;  %v2743_v29 = vsel %vm672_vm5, 0.0, %v661_v20  ;;  %v722_v35 = vrot.slane %v2730_v22, 1  ;;  %v723_v36 = vrot.slane %v687_v11, 1  ;;  %2018 = vmatprep.subr.bf16.mxu1 %v2424_v3 }
 0x172   : > { %v2747_v31 = vsel %vm672_vm5, 0.0, %v662_v23  ;;  %v747_v40 = vrot.slane %v2730_v22, 2  ;;  %v748_v41 = vrot.slane %v687_v11, 2  ;;  %v642_v42 = vmax.f32 %v626_v37, 0.0 }
 0x173   : > { %v2190_v38 = vpack.i.bf16 %v2747_v31, %v2743_v29  ;;  %v2195_v16 = vpack.i.bf16 %v2659_v7, %v2747_v31  ;;  %v724_v43 = vsel %vm395_vm0, %v722_v35, %v723_v36  ;;  %v689_v47 = vsel %vm672_vm5, %v661_v20, 0.0 }
 0x174   : > { %2156 = vrot.lane.b32.xlu1 %v2155_v10, %s2457_s11  ;;  %2019 = vmatpush3.bf16.msra.mxu1 %v2424_v3  ;;  %v690_v48 = vsel %vm672_vm5, %v662_v23, 0.0  ;;  %v2210_v49 = vpack.i.bf16 %v724_v43, %v2690_v45  ;;  %v660_v50 = vrot.slane %v642_v42, 7  ;;  %v749_v51 = vsel %vm731_vm6, %v747_v40, %v748_v41 }
 0x175   : > { %2141 = vrot.lane.b32.xlu0 %v2140_v9, %s2461_s8  ;;  %2020 = vmatprep.subr.bf16.mxu1 %v2425_v39  ;;  %v728_v52 = vrot.slane %v2743_v29, 1  ;;  %v729_v53 = vrot.slane %v689_v47, 1  ;;  %v758_v54 = vrot.slane %v2747_v31, 1  ;;  %v759_v55 = vrot.slane %v690_v48, 1 }
 0x176   : > { %v753_v45 = vrot.slane %v2743_v29, 2  ;;  %v2215_v56 = vpack.i.bf16 %v749_v51, %v2712_v59  ;;  %v754_v57 = vrot.slane %v689_v47, 2  ;;  %v761_v58 = vrot.slane %v2747_v31, 2 }
 0x177   : > { %v2784_v26 = vsel %vm672_vm5, 0.0, %v660_v50  ;;  %v762_v60 = vrot.slane %v690_v48, 2  ;;  %v688_v61 = vsel %vm672_vm5, %v660_v50, 0.0  ;;  %v730_v63 = vsel %vm395_vm0, %v728_v52, %v729_v53 }
 0x178   : > { %2161 = vrot.lane.b32.xlu1 %v2160_v19, %s2459_s13  ;;  %2021 = vmatpush3.bf16.msra.mxu1 %v2425_v39  ;;  %v760_v0 = vsel %vm395_vm0, %v758_v54, %v759_v55  ;;  %v2220_v59 = vpack.i.bf16 %v2784_v26, %v2730_v22  ;;  %v725_v1 = vrot.slane %v2784_v26, 1  ;;  %v726_v2 = vrot.slane %v688_v61, 1 }
 0x179   : > { %2166 = vrot.lane.b32.xlu0 %v2165_v18, %s2458_s12  ;;  %2022 = vmatprep.subr.bf16.mxu1 %v2426_v44  ;;  %v2230_v5 = vpack.i.bf16 %v760_v0, %v730_v63  ;;  %v755_v6 = vsel %vm731_vm6, %v753_v45, %v754_v57  ;;  %v763_v8 = vsel %vm731_vm6, %v761_v58, %v762_v60  ;;  %v751_v12 = vrot.slane %v688_v61, 2 }
 0x17a   : > { %v2225_v9 = vpack.i.bf16 %v2743_v29, %v2784_v26  ;;  %v2235_v13 = vpack.i.bf16 %v763_v8, %v755_v6  ;;  %v727_v14 = vsel %vm395_vm0, %v725_v1, %v726_v2  ;;  %v2250_v24 = vpack.i.bf16 %v2677_v15, %v760_v0 }
 0x17b   : > { %v2255_v17 = vpack.i.bf16 %v727_v14, %v724_v43  ;;  %v2240_v18 = vpack.i.bf16 %v730_v63, %v727_v14 }
 0x17c   : > { %2186 = vrot.lane.b32.xlu1 %v2185_v28, %s2461_s8  ;;  %2023 = vmatpush3.bf16.msra.mxu1 %v2426_v44 }
 0x17d   : > { %2171 = vrot.lane.b32.xlu0 %v2170_v27, %s2460_s14  ;;  %2024 = vmatprep.subr.bf16.mxu1 %v2427_v30  ;;  %v2275_v27 = vpack.i.bf16 %v2694_v46, %v763_v8 }
 0x180   : > { %2191 = vrot.lane.b32.xlu1 %v2190_v38, %s2453_s24  ;;  %2025 = vmatpush3.bf16.msra.mxu1 %v2427_v30 }
 0x181   : > { %2176 = vrot.lane.b32.xlu0 %v2155_v10, %s2462_s23  ;;  %v750_v10 = vrot.slane %v2784_v26, 2 }
 0x184   : > { %2196 = vrot.lane.b32.xlu1 %v2195_v16, %s2461_s8 }
 0x185   : > { %2181 = vrot.lane.b32.xlu0 %v2160_v19, %s2463_s27  ;;  %v752_v19 = vsel %vm731_vm6, %v750_v10, %v751_v12 }
 0x186   : > { %v2260_v20 = vpack.i.bf16 %v752_v19, %v749_v51  ;;  %v2245_v23 = vpack.i.bf16 %v755_v6, %v752_v19 }
 0x188   : > { %2201 = vrot.lane.b32.xlu1 %v2210_v49, %s2462_s23 }
 0x189   : > { %2211 = vrot.lane.b32.xlu0 %v2210_v49, %s2457_s11 }
 0x18c   : > { %2206 = vrot.lane.b32.xlu1 %v2215_v56, %s2463_s27 }
 0x18d   : > { %2216 = vrot.lane.b32.xlu0 %v2215_v56, %s2459_s13 }
 0x190   : > { %2231 = vrot.lane.b32.xlu1 %v2230_v5, %s2458_s12 }
 0x191   : > { %2221 = vrot.lane.b32.xlu0 %v2220_v59, %s2453_s24 }
 0x194   : > { %2236 = vrot.lane.b32.xlu1 %v2235_v13, %s2460_s14 }
 0x195   : > { %2226 = vrot.lane.b32.xlu0 %v2225_v9, %s2461_s8 }
 0x198   : > { %2241 = vrot.lane.b32.xlu1 %v2240_v18, %s2457_s11 }
 0x199   : > { %2256 = vrot.lane.b32.xlu0 %v2255_v17, %s2458_s12 }
 0x19c   : > { %2246 = vrot.lane.b32.xlu1 %v2245_v23, %s2459_s13 }
 0x19d   : > { %2261 = vrot.lane.b32.xlu0 %v2260_v20, %s2460_s14  ;;  %s2465_s14 = smov 96  }
 0x1a0   : > { %2251 = vrot.lane.b32.xlu1 %v2250_v24, %s2462_s23 }
 0x1a1   : > { %2266 = vrot.lane.b32.xlu0 %v2240_v18, %s2462_s23 }
 0x1a4   : > { %2276 = vrot.lane.b32.xlu1 %v2275_v27, %s2463_s27 }
 0x1a5   : > { %2271 = vrot.lane.b32.xlu0 %v2245_v23, %s2463_s27 }
 0x1da   : > { %v2122_v28 = vpop.permute.xlu1 %2121 }
 0x1db   : > { %v2127_v3 = vpop.permute.xlu0 %2126  ;;  %v2124_v56 = vunpack.i.h.bf16 %v2122_v28  ;;  %v2123_v57 = vunpack.i.l.bf16 %v2122_v28 }
 0x1dc   : > { %v2129_v39 = vunpack.i.h.bf16 %v2127_v3  ;;  %v2128_v40 = vunpack.i.l.bf16 %v2127_v3 }
 0x1de   : > { %v2815_v11 = vpop.permute.xlu1 %2146  ;;  %v958_v53 = vsel %vm956_vm8, %v2670_v25, %v2129_v39  ;;  %v957_v54 = vsel %vm956_vm8, %v2659_v7, %v2128_v40 }
 0x1df   : > { %v2132_v31 = vpop.permute.xlu0 %2131  ;;  %v2149_v28 = vunpack.i.h.bf16 %v2815_v11  ;;  %v2148_v3 = vunpack.i.l.bf16 %v2815_v11 }
 0x1e0   : > { %v2134_v41 = vunpack.i.h.bf16 %v2132_v31  ;;  %v2133_v42 = vunpack.i.l.bf16 %v2132_v31 }
 0x1e2   : > { %v2817_v34 = vpop.permute.xlu1 %2151  ;;  %v966_v58 = vsel %vm965_vm9, %v957_v54, %v2133_v42  ;;  %v967_v60 = vsel %vm965_vm9, %v958_v53, %v2134_v41 }
 0x1e3   : > { %v2137_v4 = vpop.permute.xlu0 %2136  ;;  %v2154_v41 = vunpack.i.h.bf16 %v2817_v34  ;;  %v2153_v42 = vunpack.i.l.bf16 %v2817_v34 }
 0x1e4   : > { %v2139_v16 = vunpack.i.h.bf16 %v2137_v4  ;;  %v2138_v43 = vunpack.i.l.bf16 %v2137_v4 }
 0x1e6   : > { %v2157_v36 = vpop.permute.xlu1 %2156  ;;  %v974_v61 = vsel %vm506_vm2, %v966_v58, %v2138_v43  ;;  %v975_v63 = vsel %vm506_vm2, %v967_v60, %v2139_v16 }
 0x1e7   : > { %v2142_v35 = vpop.permute.xlu0 %2141  ;;  %v2159_v44 = vunpack.i.h.bf16 %v2157_v36  ;;  %v2158_v47 = vunpack.i.l.bf16 %v2157_v36 }
 0x1e8   : > { %v2144_v13 = vunpack.i.h.bf16 %v2142_v35  ;;  %v2143_v14 = vunpack.i.l.bf16 %v2142_v35 }
 0x1e9   : > { %v960_v0 = vsel %vm956_vm8, %v2665_v21, %v2159_v44  ;;  %v959_v25 = vsel %vm956_vm8, %v2701_v32, %v2158_v47 }
 0x1ea   : > { %v2162_v38 = vpop.permute.xlu1 %2161 }
 0x1eb   : > { %v2167_v37 = vpop.permute.xlu0 %2166  ;;  %v2164_v49 = vunpack.i.h.bf16 %v2162_v38  ;;  %v2163_v50 = vunpack.i.l.bf16 %v2162_v38 }
 0x1ec   : > { %v2169_v51 = vunpack.i.h.bf16 %v2167_v37  ;;  %v2168_v30 = vunpack.i.l.bf16 %v2167_v37 }
 0x1ed   : > { %v968_v1 = vsel %vm965_vm9, %v959_v25, %v2163_v50  ;;  %v969_v2 = vsel %vm965_vm9, %v960_v0, %v2164_v49 }
 0x1ee   : > { %v2187_v52 = vpop.permute.xlu1 %2186  ;;  %v983_v5 = vsel %vm982_vm10, %v974_v61, %v2168_v30  ;;  %v984_v6 = vsel %vm982_vm10, %v975_v63, %v2169_v51  ;;  %v976_v32 = vsel %vm506_vm2, %v968_v1, %v2123_v57  ;;  %v977_v17 = vsel %vm506_vm2, %v969_v2, %v2124_v56 }
 0x1ef   : > { %v2172_v48 = vpop.permute.xlu0 %2171  ;;  %v985_v37 = vsel %vm982_vm10, %v976_v32, %v2148_v3  ;;  %v986_v38 = vsel %vm982_vm10, %v977_v17, %v2149_v28  ;;  %v2189_v16 = vunpack.i.h.bf16 %v2187_v52  ;;  %v2188_v43 = vunpack.i.l.bf16 %v2187_v52 }
 0x1f0   : > { %v2174_v55 = vunpack.i.h.bf16 %v2172_v48  ;;  %v2173_v45 = vunpack.i.l.bf16 %v2172_v48  ;;  %v994_v44 = vsel %vm991_vm11, %v985_v37, %v2153_v42  ;;  %v995_v47 = vsel %vm991_vm11, %v986_v38, %v2154_v41 }
 0x1f1   : > { %v1002_v30 = vsel %vm559_vm4, %v994_v44, %v2188_v43  ;;  %v1003_v53 = vsel %vm559_vm4, %v995_v47, %v2189_v16 }
 0x1f2   : > { %v2835_v8 = vpop.permute.xlu1 %2191  ;;  %v992_v9 = vsel %vm991_vm11, %v983_v5, %v2173_v45  ;;  %v993_v10 = vsel %vm991_vm11, %v984_v6, %v2174_v55 }
 0x1f3   : > { %v2177_v59 = vpop.permute.xlu0 %2176  ;;  %v1000_v19 = vsel %vm559_vm4, %v992_v9, %v2143_v14  ;;  %v1001_v20 = vsel %vm559_vm4, %v993_v10, %v2144_v13  ;;  %v2194_v5 = vunpack.i.h.bf16 %v2835_v8  ;;  %v2193_v6 = vunpack.i.l.bf16 %v2835_v8 }
 0x1f4   : > { %v2179_v12 = vunpack.i.h.bf16 %v2177_v59  ;;  %v2178_v21 = vunpack.i.l.bf16 %v2177_v59 }
 0x1f6   : > { %v2843_v23 = vpop.permute.xlu1 %2196  ;;  %v1009_v31 = vsel %vm1008_vm12, %v1000_v19, %v2178_v21  ;;  %v1010_v4 = vsel %vm1008_vm12, %v1001_v20, %v2179_v12 }
 0x1f7   : > { %v2182_v18 = vpop.permute.xlu0 %2181  ;;  %v2199_v21 = vunpack.i.h.bf16 %v2843_v23  ;;  %v2198_v13 = vunpack.i.l.bf16 %v2843_v23 }
 0x1f8   : > { %v2184_v24 = vunpack.i.h.bf16 %v2182_v18  ;;  %v2183_v27 = vunpack.i.l.bf16 %v2182_v18 }
 0x1fa   : > { %v1018_v35 = vsel %vm1017_vm13, %v1009_v31, %v2183_v27  ;;  %v1019_v36 = vsel %vm1017_vm13, %v1010_v4, %v2184_v24  ;;  %v2202_v11 = vpop.permute.xlu1 %2201 }
 0x1fb   : > { %v1026_v39 = vpack.c.bf16 %v1019_v36, %v1018_v35  ;;  %v2212_v40 = vpop.permute.xlu0 %2211  ;;  %v2204_v48 = vunpack.i.h.bf16 %v2202_v11  ;;  %v2203_v49 = vunpack.i.l.bf16 %v2202_v11 }
 0x1fc   : > { %v2214_v0 = vunpack.i.h.bf16 %v2212_v40  ;;  %v2213_v25 = vunpack.i.l.bf16 %v2212_v40 }
 0x1fd   : > { %2026 = vmatprep.mubr.msk.bf16.mxu1 %vm1073_vm14, %v1026_v39  ;;  %v1011_v34 = vsel %vm1008_vm12, %v1002_v30, %v2203_v49  ;;  %v1012_v52 = vsel %vm1008_vm12, %v1003_v53, %v2204_v48 }
 0x1fe   : > { %v2207_v51 = vpop.permute.xlu1 %2206  ;;  %v962_v14 = vsel %vm956_vm8, %v2730_v22, %v2214_v0  ;;  %v961_v32 = vsel %vm956_vm8, %v2680_v33, %v2213_v25 }
 0x1ff   : > { %v2217_v50 = vpop.permute.xlu0 %2216  ;;  %v2209_v54 = vunpack.i.h.bf16 %v2207_v51  ;;  %v2208_v55 = vunpack.i.l.bf16 %v2207_v51 }
 0x200   : > { %v2219_v59 = vunpack.i.h.bf16 %v2217_v50  ;;  %v2218_v1 = vunpack.i.l.bf16 %v2217_v50 }
 0x201   : > { %v1020_v45 = vsel %vm1017_vm13, %v1011_v34, %v2208_v55  ;;  %v1021_v56 = vsel %vm1017_vm13, %v1012_v52, %v2209_v54 }
 0x202   : > { %v1027_v58 = vpack.c.bf16 %v1021_v56, %v1020_v45  ;;  %v2232_v60 = vpop.permute.xlu1 %2231  ;;  %v970_v17 = vsel %vm965_vm9, %v961_v32, %v2218_v1  ;;  %v971_v18 = vsel %vm965_vm9, %v962_v14, %v2219_v59 }
 0x203   : > { %v2222_v57 = vpop.permute.xlu0 %2221  ;;  %v2234_v8 = vunpack.i.h.bf16 %v2232_v60  ;;  %v2233_v24 = vunpack.i.l.bf16 %v2232_v60 }
 0x204   : > { %2027 = vmatmul.mubr.msk.bf16.vlgmr.msra.gmra.mxu1 %vm1073_vm14, %v1027_v58  ;;  %v2224_v9 = vunpack.i.h.bf16 %v2222_v57  ;;  %v2223_v10 = vunpack.i.l.bf16 %v2222_v57 }
 0x206   : > { %v2237_v63 = vpop.permute.xlu1 %2236  ;;  %v978_v31 = vsel %vm506_vm2, %v970_v17, %v2223_v10  ;;  %v979_v23 = vsel %vm506_vm2, %v971_v18, %v2224_v9  ;;  %v2428_v17 = vld [vmem:[%s3258_s5 + $0x38] sm:$0xff]   ;;  %v2464_v18 = vmov 0  }
 0x207   : > { %v2227_v61 = vpop.permute.xlu0 %2226  ;;  %v2239_v39 = vunpack.i.h.bf16 %v2237_v63  ;;  %v2238_v40 = vunpack.i.l.bf16 %v2237_v63  ;;  %1601 = vmatprep.subr.bf16.mxu0 %v2464_v18 }
 0x208   : > { %v2229_v36 = vunpack.i.h.bf16 %v2227_v61  ;;  %v2228_v33 = vunpack.i.l.bf16 %v2227_v61  ;;  %1602 = vmatpush1.bf16.msra.mxu0 %v2428_v17 }
 0x209   : > { %1603 = vmatprep.subr.bf16.mxu0 %v2464_v18 }
 0x20a   : > { %v2242_v12 = vpop.permute.xlu1 %2241 }
 0x20b   : > { %v2257_v2 = vpop.permute.xlu0 %2256  ;;  %v2244_v19 = vunpack.i.h.bf16 %v2242_v12  ;;  %v2243_v20 = vunpack.i.l.bf16 %v2242_v12 }
 0x20c   : > { %v2259_v27 = vunpack.i.h.bf16 %v2257_v2  ;;  %v2258_v28 = vunpack.i.l.bf16 %v2257_v2 }
 0x20d   : > { %v964_v41 = vsel %vm956_vm8, %v2743_v29, %v2244_v19  ;;  %v963_v42 = vsel %vm956_vm8, %v2784_v26, %v2243_v20  ;;  %v2429_v19 = vld [vmem:[%s3258_s5 + $0x30] sm:$0xff]   ;;  %v2430_v20 = vld [vmem:[%s3258_s5 + $0x28] sm:$0xff]  }
 0x20e   : > { %v2247_v4 = vpop.permute.xlu1 %2246  ;;  %v987_v11 = vsel %vm982_vm10, %v978_v31, %v2258_v28  ;;  %v988_v16 = vsel %vm982_vm10, %v979_v23, %v2259_v27  ;;  %1604 = vmatpush1.bf16.msra.mxu0 %v2429_v19 }
 0x20f   : > { %v2262_v3 = vpop.permute.xlu0 %2261  ;;  %v2249_v37 = vunpack.i.h.bf16 %v2247_v4  ;;  %v2248_v38 = vunpack.i.l.bf16 %v2247_v4  ;;  %1605 = vmatprep.subr.bf16.mxu0 %v2464_v18 }
 0x210   : > { %v2264_v22 = vunpack.i.h.bf16 %v2262_v3  ;;  %v2263_v35 = vunpack.i.l.bf16 %v2262_v3 }
 0x211   : > { %v972_v43 = vsel %vm965_vm9, %v963_v42, %v2248_v38  ;;  %v973_v44 = vsel %vm965_vm9, %v964_v41, %v2249_v37 }
 0x212   : > { %v980_v48 = vsel %vm506_vm2, %v972_v43, %v2193_v6  ;;  %v981_v49 = vsel %vm506_vm2, %v973_v44, %v2194_v5  ;;  %v996_v50 = vsel %vm991_vm11, %v987_v11, %v2263_v35  ;;  %v997_v29 = vsel %vm991_vm11, %v988_v16, %v2264_v22  ;;  %v2252_v51 = vpop.permute.xlu1 %2251  ;;  %1606 = vmatpush1.bf16.msra.mxu0 %v2430_v20  ;;  %v2431_v35 = vld [vmem:[%s3258_s5 + $0x20] sm:$0xff]   ;;  %v2432_v16 = vld [vmem:[%s3258_s5 + $0x18] sm:$0xff]  }
 0x213   : > { %v2267_v47 = vpop.permute.xlu0 %2266  ;;  %v989_v26 = vsel %vm982_vm10, %v980_v48, %v2233_v24  ;;  %v990_v30 = vsel %vm982_vm10, %v981_v49, %v2234_v8  ;;  %v2254_v55 = vunpack.i.h.bf16 %v2252_v51  ;;  %v2253_v34 = vunpack.i.l.bf16 %v2252_v51  ;;  %1607 = vmatprep.subr.bf16.mxu0 %v2464_v18 }
 0x214   : > { %v2269_v53 = vunpack.i.h.bf16 %v2267_v47  ;;  %v2268_v54 = vunpack.i.l.bf16 %v2267_v47  ;;  %v998_v52 = vsel %vm991_vm11, %v989_v26, %v2238_v40  ;;  %v999_v45 = vsel %vm991_vm11, %v990_v30, %v2239_v39 }
 0x215   : > { %v1006_v56 = vsel %vm559_vm4, %v998_v52, %v2198_v13  ;;  %v1007_v57 = vsel %vm559_vm4, %v999_v45, %v2199_v21  ;;  %v1004_v60 = vsel %vm559_vm4, %v996_v50, %v2228_v33  ;;  %v1005_v61 = vsel %vm559_vm4, %v997_v29, %v2229_v36  ;;  %v2433_v29 = vld [vmem:[%s3258_s5 + $0x10] sm:$0xff]  }
 0x216   : > { %v2277_v63 = vpop.permute.xlu1 %2276  ;;  %v1013_v59 = vsel %vm1008_vm12, %v1004_v60, %v2268_v54  ;;  %v1014_v1 = vsel %vm1008_vm12, %v1005_v61, %v2269_v53  ;;  %v1015_v6 = vsel %vm1008_vm12, %v1006_v56, %v2253_v34  ;;  %v1016_v9 = vsel %vm1008_vm12, %v1007_v57, %v2254_v55  ;;  %1608 = vmatpush1.bf16.msra.mxu0 %v2431_v35 }
 0x217   : > { %v2272_v58 = vpop.permute.xlu0 %2271  ;;  %v2279_v2 = vunpack.i.h.bf16 %v2277_v63  ;;  %v2278_v5 = vunpack.i.l.bf16 %v2277_v63  ;;  %1609 = vmatprep.subr.bf16.mxu0 %v2464_v18  ;;  %v2434_v63 = vld [vmem:[%s3258_s5 + $0x8] sm:$0xff]  }
 0x218   : > { %v2274_v0 = vunpack.i.h.bf16 %v2272_v58  ;;  %v2273_v25 = vunpack.i.l.bf16 %v2272_v58 }
 0x219   : > { %v1024_v21 = vsel %vm1017_vm13, %v1015_v6, %v2278_v5  ;;  %v1025_v13 = vsel %vm1017_vm13, %v1016_v9, %v2279_v2 }
 0x21a   : > { %v1022_v10 = vsel %vm1017_vm13, %v1013_v59, %v2273_v25  ;;  %v1023_v12 = vsel %vm1017_vm13, %v1014_v1, %v2274_v0  ;;  %v1029_v32 = vpack.c.bf16 %v1025_v13, %v1024_v21  ;;  %1610 = vmatpush1.bf16.msra.mxu0 %v2432_v16 }
 0x21b   : > { %v1028_v14 = vpack.c.bf16 %v1023_v12, %v1022_v10  ;;  %1611 = vmatprep.subr.bf16.mxu0 %v2464_v18 }
 0x21d   : > { %2030 = vmatprep.mubr.msk.bf16.mxu1 %vm1073_vm14, %v1028_v14  ;;  %v2435_v14 = vld [vmem:[%s3258_s5] sm:$0xff]  }
 0x21e   : > { %2031 = vmatmul.mubr.msk.bf16.gmra.mxu1 %vm1073_vm14, %v1029_v32  ;;  %1612 = vmatpush1.bf16.msra.mxu0 %v2433_v29 }
 0x21f   : > { %1843 = vmatprep.mubr.f32.mxu1 %v2456_v62  ;;  %v2924_v62 = vld [vmem:[%s3257_s4] ss:$0 sm:$0xff]  ;;  %1613 = vmatprep.subr.bf16.mxu0 %v2464_v18 }
 0x222   : > { %1614 = vmatpush1.bf16.msra.mxu0 %v2434_v63 }
 0x223   : > { %1615 = vmatprep.subr.bf16.mxu0 %v2464_v18 }
 0x226   : > { %1616 = vmatpush1.bf16.msra.mxu0 %v2435_v14 }
 0x227   : > { %1631 = vmatprep.subr.bf16.mxu0 %v2464_v18 }
 0x2c4   : > { %v2028_v8 = vpop.f32.mrf.mxu1 }
 0x2c5   : > { %v1133_v24 = vadd.f32 %v2028_v8, %v2924_v62 }
 0x2c6   : > { %v1124_v27 = vpop.f32.mrf.mxu1 }
 0x2c7   : > { %v1157_v28 = vmax.f32 %v1133_v24, 0.0  ;;  %v1125_v3 = vadd.f32 %v2924_v62, %v1124_v27 }
 0x2c8   : > { %v2029_v31 = vpop.f32.mrf.mxu1 }
 0x2c9   : > { %v1173_v23 = vrot.slane %v1157_v28, 7  ;;  %v1155_v4 = vmax.f32 %v1125_v3, 0.0  ;;  %v1136_v22 = vadd.f32 %v2029_v31, %v2924_v62 }
 0x2ca   : > { %v1127_v36 = vpop.f32.mrf.mxu1 }
 0x2cb   : > { %v1171_v33 = vrot.slane %v1155_v4, 7  ;;  %v1158_v37 = vmax.f32 %v1136_v22, 0.0  ;;  %v2933_v38 = vsel %vm672_vm5, 0.0, %v1173_v23  ;;  %v1128_v39 = vadd.f32 %v2924_v62, %v1127_v36 }
 0x2cc   : > { %v1197_v40 = vsel %vm672_vm5, %v1173_v23, 0.0  ;;  %v1244_v55 = vrot.slane %v2933_v38, 2  ;;  %v1223_v0 = vrot.slane %v2933_v38, 1  ;;  %v2436_v23 = vld [vmem:[%s3258_s5 + $0x40] sm:$0xff]  }
 0x2cd   : > { %v2939_v41 = vsel %vm672_vm5, 0.0, %v1171_v33  ;;  %v1195_v42 = vsel %vm672_vm5, %v1171_v33, 0.0  ;;  %v1174_v11 = vrot.slane %v1158_v37, 7  ;;  %v1156_v50 = vmax.f32 %v1128_v39, 0.0  ;;  %1632 = vmatpush2.bf16.msra.mxu0 %v2436_v23 }
 0x2ce   : > { %v1217_v43 = vrot.slane %v2939_v41, 1  ;;  %v1218_v44 = vrot.slane %v1195_v42, 1  ;;  %v1238_v47 = vrot.slane %v2939_v41, 2  ;;  %v1239_v48 = vrot.slane %v1195_v42, 2 }
 0x2cf   : > { %v2948_v49 = vsel %vm672_vm5, 0.0, %v1174_v11  ;;  %v1245_v51 = vrot.slane %v1197_v40, 2  ;;  %v1198_v26 = vsel %vm672_vm5, %v1174_v11, 0.0  ;;  %v1172_v30 = vrot.slane %v1156_v50, 7 }
 0x2d0   : > { %v2280_v53 = vpack.i.bf16 %v2948_v49, %v2933_v38  ;;  %v2958_v54 = vsel %vm395_vm0, %v1217_v43, %v1218_v44  ;;  %v1240_v52 = vsel %vm731_vm6, %v1238_v47, %v1239_v48  ;;  %v1226_v45 = vrot.slane %v2948_v49, 1 }
 0x2d1   : > { %v2285_v34 = vpack.i.bf16 %v2958_v54, %v2677_v15  ;;  %v1227_v56 = vrot.slane %v1198_v26, 1  ;;  %v2966_v57 = vsel %vm672_vm5, 0.0, %v1172_v30  ;;  %v1196_v58 = vsel %vm672_vm5, %v1172_v30, 0.0 }
 0x2d2   : > { %2281 = vrot.lane.b32.xlu1 %v2280_v53, %s2461_s8  ;;  %v1242_v60 = vrot.slane %v1196_v58, 2  ;;  %v1241_v61 = vrot.slane %v2966_v57, 2  ;;  %v1224_v25 = vrot.slane %v1197_v40, 1  ;;  %v2290_v59 = vpack.i.bf16 %v1240_v52, %v2694_v46 }
 0x2d3   : > { %2286 = vrot.lane.b32.xlu0 %v2285_v34, %s2459_s13  ;;  %v1246_v1 = vsel %vm731_vm6, %v1244_v55, %v1245_v51  ;;  %v1247_v2 = vrot.slane %v2948_v49, 2  ;;  %v1248_v5 = vrot.slane %v1198_v26, 2  ;;  %v2295_v9 = vpack.i.bf16 %v2966_v57, %v2939_v41 }
 0x2d4   : > { %v1243_v6 = vsel %vm731_vm6, %v1241_v61, %v1242_v60  ;;  %v2985_v12 = vsel %vm395_vm0, %v1226_v45, %v1227_v56  ;;  %v2300_v21 = vpack.i.bf16 %v2933_v38, %v2966_v57  ;;  %v1225_v13 = vsel %vm395_vm0, %v1223_v0, %v1224_v25 }
 0x2d5   : > { %v1503_v10 = vpack.c.bf16 %v1246_v1, %v1243_v6  ;;  %v1220_v32 = vrot.slane %v2966_v57, 1  ;;  %v1221_v17 = vrot.slane %v1196_v58, 1  ;;  %v2305_v19 = vpack.i.bf16 %v2985_v12, %v1225_v13 }
 0x2d6   : > { %2291 = vrot.lane.b32.xlu1 %v2290_v59, %s2458_s12  ;;  %v2999_v20 = vsel %vm731_vm6, %v1247_v2, %v1248_v5  ;;  %v2320_v28 = vpack.i.bf16 %v1243_v6, %v1240_v52  ;;  %v2335_v29 = vpack.i.bf16 %v1246_v1, %v1243_v6 }
 0x2d7   : > { %2296 = vrot.lane.b32.xlu0 %v2295_v9, %s2461_s8  ;;  %1975 = vmatprep.mubr.msk.bf16.mxu0 %vm965_vm9, %v1503_v10  ;;  %v2310_v27 = vpack.i.bf16 %v2999_v20, %v1246_v1  ;;  %v1222_v31 = vsel %vm395_vm0, %v1220_v32, %v1221_v17 }
 0x2d8   : > { %v2315_v33 = vpack.i.bf16 %v1222_v31, %v2958_v54  ;;  %v2325_v37 = vpack.i.bf16 %v1225_v13, %v1222_v31 }
 0x2da   : > { %2301 = vrot.lane.b32.xlu1 %v2300_v21, %s2465_s14 }
 0x2db   : > { %2306 = vrot.lane.b32.xlu0 %v2305_v19, %s2463_s27 }
 0x2de   : > { %v2032_v8 = vpop.f32.mrf.mxu1  ;;  %2311 = vrot.lane.b32.xlu1 %v2310_v27, %s2466_s19 }
 0x2df   : > { %v1149_v24 = vadd.f32 %v2032_v8, %v2924_v62  ;;  %2321 = vrot.lane.b32.xlu0 %v2320_v28, %s2466_s19 }
 0x2e0   : > { %v1140_v3 = vpop.f32.mrf.mxu1 }
 0x2e1   : > { %v1141_v4 = vadd.f32 %v2924_v62, %v1140_v3  ;;  %v1161_v22 = vmax.f32 %v1149_v24, 0.0 }
 0x2e2   : > { %v2033_v35 = vpop.f32.mrf.mxu1  ;;  %2316 = vrot.lane.b32.xlu1 %v2315_v33, %s2463_s27 }
 0x2e3   : > { %v1159_v36 = vmax.f32 %v1141_v4, 0.0  ;;  %v1152_v18 = vadd.f32 %v2033_v35, %v2924_v62  ;;  %v1177_v11 = vrot.slane %v1161_v22, 7  ;;  %2326 = vrot.lane.b32.xlu0 %v2325_v37, %s2467_s20 }
 0x2e4   : > { %v1143_v39 = vpop.f32.mrf.mxu1 }
 0x2e5   : > { %v1175_v40 = vrot.slane %v1159_v36, 7  ;;  %v1162_v42 = vmax.f32 %v1152_v18, 0.0  ;;  %v1144_v47 = vadd.f32 %v2924_v62, %v1143_v39  ;;  %v3028_v30 = vsel %vm672_vm5, 0.0, %v1177_v11 }
 0x2e6   : > { %2331 = vrot.lane.b32.xlu1 %v2325_v37, %s2459_s13  ;;  %v1201_v53 = vsel %vm672_vm5, %v1177_v11, 0.0  ;;  %v1256_v56 = vrot.slane %v3028_v30, 2 }
 0x2e7   : > { %v3018_v16 = vsel %vm672_vm5, 0.0, %v1175_v40  ;;  %v1199_v43 = vsel %vm672_vm5, %v1175_v40, 0.0  ;;  %v1178_v44 = vrot.slane %v1162_v42, 7  ;;  %v1160_v26 = vmax.f32 %v1144_v47, 0.0  ;;  %2336 = vrot.lane.b32.xlu0 %v2335_v29, %s2458_s12 }
 0x2e8   : > { %v1229_v48 = vrot.slane %v3018_v16, 1  ;;  %v1230_v50 = vrot.slane %v1199_v43, 1  ;;  %v2340_v62 = vpack.i.bf16 %v3018_v16, %v2948_v49  ;;  %v1250_v54 = vrot.slane %v3018_v16, 2 }
 0x2e9   : > { %v3024_v51 = vsel %vm672_vm5, 0.0, %v1178_v44  ;;  %v1251_v55 = vrot.slane %v1199_v43, 2  ;;  %v1176_v34 = vrot.slane %v1160_v26, 7  ;;  %v1257_v61 = vrot.slane %v1201_v53, 2 }
 0x2ea   : > { %v2345_v52 = vpack.i.bf16 %v3024_v51, %v3028_v30  ;;  %v1231_v45 = vsel %vm395_vm0, %v1229_v48, %v1230_v50  ;;  %v1202_v63 = vsel %vm672_vm5, %v1178_v44, 0.0  ;;  %v1261_v5 = vrot.slane %v3024_v51, 1 }
 0x2eb   : > { %v3040_v58 = vsel %vm672_vm5, 0.0, %v1176_v34  ;;  %v1200_v60 = vsel %vm672_vm5, %v1176_v34, 0.0  ;;  %2341 = vrot.lane.b32.xlu0 %v2340_v62, %s2465_s14  ;;  %v2350_v59 = vpack.i.bf16 %v1231_v45, %v2985_v12  ;;  %v3049_v1 = vsel %vm731_vm6, %v1250_v54, %v1251_v55 }
 0x2ec   : > { %2346 = vrot.lane.b32.xlu1 %v2345_v52, %s2461_s8  ;;  %v1253_v0 = vrot.slane %v3040_v58, 2  ;;  %v1254_v25 = vrot.slane %v1200_v60, 2  ;;  %v1262_v6 = vrot.slane %v1202_v63, 1  ;;  %v3058_v9 = vsel %vm731_vm6, %v1256_v56, %v1257_v61 }
 0x2ed   : > { %v1505_v10 = vpack.c.bf16 %v3049_v1, %v2999_v20  ;;  %v1235_v12 = vrot.slane %v3028_v30, 1  ;;  %v1236_v21 = vrot.slane %v1201_v53, 1  ;;  %v2360_v13 = vpack.i.bf16 %v3049_v1, %v2999_v20 }
 0x2ee   : > { %v3052_v2 = vsel %vm731_vm6, %v1253_v0, %v1254_v25  ;;  %v1232_v32 = vrot.slane %v3040_v58, 1  ;;  %v1233_v17 = vrot.slane %v1200_v60, 1  ;;  %v2365_v19 = vpack.i.bf16 %v3040_v58, %v3018_v16 }
 0x2ef   : > { %2356 = vrot.lane.b32.xlu0 %v2350_v59, %s2459_s13  ;;  %v1507_v14 = vpack.c.bf16 %v3058_v9, %v3052_v2  ;;  %v1263_v8 = vsel %vm395_vm0, %v1261_v5, %v1262_v6  ;;  %v1237_v24 = vsel %vm395_vm0, %v1235_v12, %v1236_v21  ;;  %v2370_v27 = vpack.i.bf16 %v3028_v30, %v3040_v58 }
 0x2f0   : > { %2351 = vrot.lane.b32.xlu1 %v2350_v59, %s2467_s20  ;;  %v2375_v28 = vpack.i.bf16 %v1263_v8, %v1237_v24  ;;  %v1234_v3 = vsel %vm395_vm0, %v1232_v32, %v1233_v17  ;;  %v1264_v23 = vrot.slane %v3024_v51, 2  ;;  %v1265_v4 = vrot.slane %v1202_v63, 2 }
 0x2f1   : > { %v2380_v31 = vpack.i.bf16 %v1234_v3, %v1231_v45  ;;  %v2385_v22 = vpack.i.bf16 %v3052_v2, %v3049_v1  ;;  %v2395_v35 = vpack.i.bf16 %v1237_v24, %v1234_v3  ;;  %v2405_v33 = vpack.i.bf16 %v3058_v9, %v3052_v2 }
 0x2f2   : > { %v3085_v36 = vsel %vm731_vm6, %v1264_v23, %v1265_v4  ;;  %v2415_v37 = vpack.i.bf16 %v2677_v15, %v1263_v8  ;;  %v2410_v39 = vpack.i.bf16 %v2659_v7, %v3024_v51  ;;  %vm1484_vm0 = vcmask 785408  }
 0x2f3   : > { %2366 = vrot.lane.b32.xlu0 %v2365_v19, %s2461_s8  ;;  %v2400_v18 = vpack.i.bf16 %v3085_v36, %v3058_v9 }
 0x2f4   : > { %2361 = vrot.lane.b32.xlu1 %v2360_v13, %s2458_s12 }
 0x2f7   : > { %2376 = vrot.lane.b32.xlu0 %v2375_v28, %s2463_s27 }
 0x2f8   : > { %2371 = vrot.lane.b32.xlu1 %v2370_v27, %s2465_s14 }
 0x2fb   : > { %2386 = vrot.lane.b32.xlu0 %v2385_v22, %s2466_s19 }
 0x2fc   : > { %2381 = vrot.lane.b32.xlu1 %v2380_v31, %s2463_s27 }
 0x2ff   : > { %2391 = vrot.lane.b32.xlu0 %v2395_v35, %s2467_s20 }
 0x300   : > { %2396 = vrot.lane.b32.xlu1 %v2395_v35, %s2459_s13 }
 0x303   : > { %2406 = vrot.lane.b32.xlu0 %v2405_v33, %s2458_s12 }
 0x304   : > { %2401 = vrot.lane.b32.xlu1 %v2400_v18, %s2466_s19  ;;  %s1946_s19 = sshll.u32 %s3265_s16, 1 }
 0x305   : > { %s359_s13 = scalar_lea.vmem %s3263_s10, %s1946_s19 }
 0x307   : > { %2411 = vrot.lane.b32.xlu0 %v2410_v39, %s2465_s14 }
 0x308   : > { %2416 = vrot.lane.b32.xlu1 %v2415_v37, %s2467_s20 }
 0x344   : > { %v2282_v40 = vpop.permute.xlu1 %2281 }
 0x345   : > { %v2287_v42 = vpop.permute.xlu0 %2286  ;;  %v2284_v56 = vunpack.i.h.bf16 %v2282_v40  ;;  %v2283_v35 = vunpack.i.l.bf16 %v2282_v40 }
 0x346   : > { %v2289_v48 = vunpack.i.h.bf16 %v2287_v42  ;;  %v2288_v50 = vunpack.i.l.bf16 %v2287_v42 }
 0x348   : > { %v2292_v11 = vpop.permute.xlu1 %2291  ;;  %v1444_v51 = vsel %vm965_vm9, %v2939_v41, %v2289_v48  ;;  %v1443_v62 = vsel %vm965_vm9, %v2659_v7, %v2288_v50 }
 0x349   : > { %v2297_v43 = vpop.permute.xlu0 %2296  ;;  %v2294_v29 = vunpack.i.h.bf16 %v2292_v11  ;;  %v2293_v26 = vunpack.i.l.bf16 %v2292_v11 }
 0x34a   : > { %v2299_v54 = vunpack.i.h.bf16 %v2297_v43  ;;  %v2298_v55 = vunpack.i.l.bf16 %v2297_v43 }
 0x34b   : > { %v1451_v34 = vsel %vm982_vm10, %v1443_v62, %v2293_v26  ;;  %v1452_v52 = vsel %vm982_vm10, %v1444_v51, %v2294_v29 }
 0x34c   : > { %v2302_v44 = vpop.permute.xlu1 %2301  ;;  %v1459_v0 = vsel %vm559_vm4, %v1451_v34, %v2298_v55  ;;  %v1460_v41 = vsel %vm559_vm4, %v1452_v52, %v2299_v54 }
 0x34d   : > { %v3100_v47 = vpop.permute.xlu0 %2306  ;;  %v2304_v59 = vunpack.i.h.bf16 %v2302_v44  ;;  %v2303_v5 = vunpack.i.l.bf16 %v2302_v44 }
 0x34e   : > { %v2309_v39 = vunpack.i.h.bf16 %v3100_v47  ;;  %v2308_v42 = vunpack.i.l.bf16 %v3100_v47 }
 0x350   : > { %v2312_v53 = vpop.permute.xlu1 %2311 }
 0x351   : > { %v2322_v15 = vpop.permute.xlu0 %2321  ;;  %v2314_v48 = vunpack.i.h.bf16 %v2312_v53  ;;  %v2313_v50 = vunpack.i.l.bf16 %v2312_v53 }
 0x352   : > { %v2324_v25 = vunpack.i.h.bf16 %v2322_v15  ;;  %v2323_v7 = vunpack.i.l.bf16 %v2322_v15 }
 0x354   : > { %v2317_v45 = vpop.permute.xlu1 %2316 }
 0x355   : > { %v2319_v60 = vunpack.i.h.bf16 %v2317_v45  ;;  %v2318_v61 = vunpack.i.l.bf16 %v2317_v45  ;;  %v2327_v63 = vpop.permute.xlu0 %2326 }
 0x356   : > { %v2329_v32 = vunpack.i.h.bf16 %v2327_v63  ;;  %v2328_v17 = vunpack.i.l.bf16 %v2327_v63 }
 0x357   : > { %v1467_v6 = vsel %vm1017_vm13, %v1459_v0, %v2318_v61  ;;  %v1468_v12 = vsel %vm1017_vm13, %v1460_v41, %v2319_v60 }
 0x358   : > { %v1476_v21 = vsel %vm1475_vm15, %v1467_v6, %v2323_v7  ;;  %v1477_v13 = vsel %vm1475_vm15, %v1468_v12, %v2324_v25  ;;  %v2332_v19 = vpop.permute.xlu1 %2331 }
 0x359   : > { %v2334_v8 = vunpack.i.h.bf16 %v2332_v19  ;;  %v2333_v24 = vunpack.i.l.bf16 %v2332_v19  ;;  %v2337_v27 = vpop.permute.xlu0 %2336  ;;  %v1485_v28 = vsel %vm1484_vm0, %v1476_v21, %v2303_v5  ;;  %v1486_v3 = vsel %vm1484_vm0, %v1477_v13, %v2304_v59 }
 0x35a   : > { %v2339_v31 = vunpack.i.h.bf16 %v2337_v27  ;;  %v2338_v23 = vunpack.i.l.bf16 %v2337_v27  ;;  %v1494_v4 = vsel %vm1493_vm1, %v1485_v28, %v2328_v17  ;;  %v1495_v22 = vsel %vm1493_vm1, %v1486_v3, %v2329_v32 }
 0x35b   : > { %v1446_v18 = vsel %vm965_vm9, %v2933_v38, %v2334_v8  ;;  %v1445_v33 = vsel %vm965_vm9, %v2966_v57, %v2333_v24  ;;  %v1502_v37 = vpack.c.bf16 %v1495_v22, %v1494_v4 }
 0x35c   : > { %v1454_v11 = vsel %vm982_vm10, %v1446_v18, %v2339_v31  ;;  %v1453_v43 = vsel %vm982_vm10, %v1445_v33, %v2338_v23 }
 0x35d   : > { %v1462_v40 = vsel %vm559_vm4, %v1454_v11, %v2284_v56  ;;  %v1461_v38 = vsel %vm559_vm4, %v1453_v43, %v2283_v35  ;;  %v2342_v29 = vpop.permute.xlu0 %2341  ;;  %1634 = vmatmul.mubr.bf16.vlgmr.msra.gmra.mxu0 %v1502_v37 }
 0x35e   : > { %v3126_v44 = vpop.permute.xlu1 %2346  ;;  %v2344_v57 = vunpack.i.h.bf16 %v2342_v29  ;;  %v2343_v26 = vunpack.i.l.bf16 %v2342_v29  ;;  %v1469_v15 = vsel %vm1017_vm13, %v1461_v38, %v2308_v42  ;;  %v1470_v47 = vsel %vm1017_vm13, %v1462_v40, %v2309_v39  ;;  %1976 = vmatprep.mubr.msk.bf16.mxu0 %vm965_vm9, %v1505_v10 }
 0x35f   : > { %v1478_v51 = vsel %vm1475_vm15, %v1469_v15, %v2313_v50  ;;  %v1479_v53 = vsel %vm1475_vm15, %v1470_v47, %v2314_v48  ;;  %v1509_v48 = vpack.c.bf16 %v2694_v46, %v3085_v36  ;;  %v2349_v38 = vunpack.i.h.bf16 %v3126_v44 }
 0x360   : > { %v1487_v52 = vsel %vm1484_vm0, %v1478_v51, %v2343_v26  ;;  %v1488_v45 = vsel %vm1484_vm0, %v1479_v53, %v2344_v57  ;;  %v2348_v29 = vunpack.i.l.bf16 %v3126_v44 }
 0x361   : > { %v2357_v54 = vpop.permute.xlu0 %2356 }
 0x362   : > { %v2352_v62 = vpop.permute.xlu1 %2351  ;;  %v2359_v10 = vunpack.i.h.bf16 %v2357_v54  ;;  %v2358_v63 = vunpack.i.l.bf16 %v2357_v54 }
 0x363   : > { %v2354_v55 = vunpack.i.h.bf16 %v2352_v62  ;;  %v2353_v34 = vunpack.i.l.bf16 %v2352_v62 }
 0x364   : > { %v1448_v59 = vsel %vm965_vm9, %v3018_v16, %v2359_v10  ;;  %v1447_v5 = vsel %vm965_vm9, %v2948_v49, %v2358_v63 }
 0x365   : > { %v1496_v56 = vsel %vm1493_vm1, %v1487_v52, %v2353_v34  ;;  %v1497_v60 = vsel %vm1493_vm1, %v1488_v45, %v2354_v55  ;;  %v2367_v1 = vpop.permute.xlu0 %2366 }
 0x366   : > { %v2362_v61 = vpop.permute.xlu1 %2361  ;;  %v1504_v20 = vpack.c.bf16 %v1497_v60, %v1496_v56  ;;  %v2369_v21 = vunpack.i.h.bf16 %v2367_v1  ;;  %v2368_v13 = vunpack.i.l.bf16 %v2367_v1 }
 0x367   : > { %v2364_v0 = vunpack.i.h.bf16 %v2362_v61  ;;  %v2363_v41 = vunpack.i.l.bf16 %v2362_v61 }
 0x368   : > { %1642 = vmatmul.mubr.bf16.gmra.mxu0 %v1504_v20 }
 0x369   : > { %1977 = vmatprep.mubr.msk.bf16.mxu0 %vm965_vm9, %v1507_v14  ;;  %v2377_v7 = vpop.permute.xlu0 %2376  ;;  %v1455_v6 = vsel %vm982_vm10, %v1447_v5, %v2363_v41  ;;  %v1456_v12 = vsel %vm982_vm10, %v1448_v59, %v2364_v0 }
 0x36a   : > { %v2372_v25 = vpop.permute.xlu1 %2371  ;;  %v1463_v8 = vsel %vm559_vm4, %v1455_v6, %v2368_v13  ;;  %v1464_v24 = vsel %vm559_vm4, %v1456_v12, %v2369_v21  ;;  %v2379_v15 = vunpack.i.h.bf16 %v2377_v7  ;;  %v2378_v47 = vunpack.i.l.bf16 %v2377_v7  ;;  %v1965_v7 = vld [vmem:[%s3259_s6] ss:$0 sm:$0xff] }
 0x36b   : > { %v2374_v16 = vunpack.i.h.bf16 %v2372_v25  ;;  %v2373_v27 = vunpack.i.l.bf16 %v2372_v25  ;;  %v1979_v12 = vld [vmem:[%s3260_s7] ss:$0 sm:$0xff] }
 0x36d   : > { %v2387_v17 = vpop.permute.xlu0 %2386 }
 0x36e   : > { %v2382_v32 = vpop.permute.xlu1 %2381  ;;  %v2389_v9 = vunpack.i.h.bf16 %v2387_v17  ;;  %v2388_v14 = vunpack.i.l.bf16 %v2387_v17 }
 0x36f   : > { %v2384_v19 = vunpack.i.h.bf16 %v2382_v32  ;;  %v2383_v2 = vunpack.i.l.bf16 %v2382_v32 }
 0x371   : > { %v1471_v49 = vsel %vm1017_vm13, %v1463_v8, %v2383_v2  ;;  %v1472_v28 = vsel %vm1017_vm13, %v1464_v24, %v2384_v19  ;;  %v2392_v4 = vpop.permute.xlu0 %2391 }
 0x372   : > { %v1480_v3 = vsel %vm1475_vm15, %v1471_v49, %v2388_v14  ;;  %v1481_v31 = vsel %vm1475_vm15, %v1472_v28, %v2389_v9  ;;  %v2397_v23 = vpop.permute.xlu1 %2396  ;;  %v2394_v18 = vunpack.i.h.bf16 %v2392_v4  ;;  %v2393_v33 = vunpack.i.l.bf16 %v2392_v4 }
 0x373   : > { %v1489_v22 = vsel %vm1484_vm0, %v1480_v3, %v2373_v27  ;;  %v1490_v35 = vsel %vm1484_vm0, %v1481_v31, %v2374_v16  ;;  %v2399_v37 = vunpack.i.h.bf16 %v2397_v23  ;;  %v2398_v39 = vunpack.i.l.bf16 %v2397_v23 }
 0x374   : > { %v1498_v11 = vsel %vm1493_vm1, %v1489_v22, %v2393_v33  ;;  %v1499_v43 = vsel %vm1493_vm1, %v1490_v35, %v2394_v18 }
 0x375   : > { %v2407_v50 = vpop.permute.xlu0 %2406  ;;  %v1506_v40 = vpack.c.bf16 %v1499_v43, %v1498_v11  ;;  %v1450_v51 = vsel %vm965_vm9, %v3028_v30, %v2399_v37  ;;  %v1449_v53 = vsel %vm965_vm9, %v3040_v58, %v2398_v39 }
 0x376   : > { %v2402_v42 = vpop.permute.xlu1 %2401  ;;  %v2409_v57 = vunpack.i.h.bf16 %v2407_v50  ;;  %v2408_v26 = vunpack.i.l.bf16 %v2407_v50 }
 0x377   : > { %1650 = vmatmul.mubr.bf16.gmra.mxu0 %v1506_v40  ;;  %v2404_v36 = vunpack.i.h.bf16 %v2402_v42  ;;  %v2403_v54 = vunpack.i.l.bf16 %v2402_v42 }
 0x378   : > { %v1458_v62 = vsel %vm982_vm10, %v1450_v51, %v2409_v57  ;;  %v1457_v46 = vsel %vm982_vm10, %v1449_v53, %v2408_v26  ;;  %1978 = vmatprep.mubr.msk.bf16.mxu0 %vm965_vm9, %v1509_v48 }
 0x379   : > { %v1466_v55 = vsel %vm559_vm4, %v1458_v62, %v2349_v38  ;;  %v1465_v34 = vsel %vm559_vm4, %v1457_v46, %v2348_v29  ;;  %v2412_v52 = vpop.permute.xlu0 %2411 }
 0x37a   : > { %v2417_v44 = vpop.permute.xlu1 %2416  ;;  %v1473_v56 = vsel %vm1017_vm13, %v1465_v34, %v2378_v47  ;;  %v1474_v58 = vsel %vm1017_vm13, %v1466_v55, %v2379_v15  ;;  %v2414_v60 = vunpack.i.h.bf16 %v2412_v52  ;;  %v2413_v61 = vunpack.i.l.bf16 %v2412_v52  ;;  %v1743_v52 = vld [vmem:[%s3262_s9 + $0x78] sm:$0xff] }
 0x37b   : > { %v2419_v45 = vunpack.i.h.bf16 %v2417_v44  ;;  %v2418_v30 = vunpack.i.l.bf16 %v2417_v44  ;;  %v1482_v20 = vsel %vm1475_vm15, %v1473_v56, %v2403_v54  ;;  %v1483_v1 = vsel %vm1475_vm15, %v1474_v58, %v2404_v36  ;;  %1795 = vmatprep.subr.mxu1 %v1743_v52  ;;  %v1740_v56 = vld [vmem:[%s3262_s9 + $0x60] sm:$0xff]  ;;  %v1739_v58 = vld [vmem:[%s3262_s9 + $0x58] sm:$0xff] }
 0x37c   : > { %v1491_v10 = vsel %vm1484_vm0, %v1482_v20, %v2413_v61  ;;  %v1492_v63 = vsel %vm1484_vm0, %v1483_v1, %v2414_v60  ;;  %v1738_v60 = vld [vmem:[%s3262_s9 + $0x50] sm:$0xff]  ;;  %v1737_v61 = vld [vmem:[%s3262_s9 + $0x48] sm:$0xff]  ;;  %v1736_v20 = vld [vmem:[%s3262_s9 + $0x40] sm:$0xff] }
 0x37d   : > { %v1500_v0 = vsel %vm1493_vm1, %v1491_v10, %v2418_v30  ;;  %v1501_v41 = vsel %vm1493_vm1, %v1492_v63, %v2419_v45  ;;  %v1742_v45 = vld [vmem:[%s3262_s9 + $0x70] sm:$0xff]  ;;  %v1741_v30 = vld [vmem:[%s3262_s9 + $0x68] sm:$0xff]  ;;  %v1735_v1 = vld [vmem:[%s3262_s9 + $0x38] sm:$0xff] }
 0x37e   : > { %v1508_v25 = vpack.c.bf16 %v1501_v41, %v1500_v0  ;;  %1796 = vmatpush1.msra.mxu1 %v1742_v45  ;;  %v1734_v10 = vld [vmem:[%s3262_s9 + $0x30] sm:$0xff]  ;;  %v1733_v63 = vld [vmem:[%s3262_s9 + $0x28] sm:$0xff]  ;;  %v1732_v0 = vld [vmem:[%s3262_s9 + $0x20] sm:$0xff] }
 0x37f   : > { %1797 = vmatprep.subr.mxu1 %v1741_v30  ;;  %v1731_v41 = vld [vmem:[%s3262_s9 + $0x18] sm:$0xff] }
 0x380   : > { %1658 = vmatmul.mubr.bf16.gmra.mxu0 %v1508_v25  ;;  %1798 = vmatpush1.msra.mxu1 %v1740_v56  ;;  %v1730_v25 = vld [vmem:[%s3262_s9 + $0x10] sm:$0xff] }
 0x381   : > { %1799 = vmatprep.subr.mxu1 %v1739_v58 }
 0x382   : > { %1800 = vmatpush1.msra.mxu1 %v1738_v60 }
 0x383   : > { %1801 = vmatprep.subr.mxu1 %v1737_v61 }
 0x384   : > { %1802 = vmatpush1.msra.mxu1 %v1736_v20 }
 0x385   : > { %1803 = vmatprep.subr.mxu1 %v1735_v1 }
 0x386   : > { %1804 = vmatpush1.msra.mxu1 %v1734_v10 }
 0x387   : > { %1805 = vmatprep.subr.mxu1 %v1733_v63 }
 0x388   : > { %1806 = vmatpush1.msra.mxu1 %v1732_v0 }
 0x389   : > { %1807 = vmatprep.subr.mxu1 %v1731_v41 }
 0x38a   : > { %1808 = vmatpush1.msra.mxu1 %v1730_v25 }
 0x41d   : > { %v1635_v59 = vpop.f32.mrf.mxu0 }
 0x41e   : > { %v1636_v5 = vadd.f32 %v1965_v7, %v1635_v59  ;;  %v1728_v59 = vld [vmem:[%s3262_s9] sm:$0xff] }
 0x41f   : > { %v1637_v6 = vpop.f32.mrf.mxu0 }
 0x420   : > { %v1666_v21 = vmax.f32 %v1636_v5, 0.0  ;;  %v1980_v5 = vld [vmem:[#allocation2] ss:$0 sm:$0xff] }
 0x421   : > { %v1638_v13 = vpop.f32.mrf.mxu0 }
 0x422   : > { %v1639_v32 = vadd.f32 %v1965_v7, %v1638_v13  ;;  %v1681_v17 = vmul.f32 %v1979_v12, %v1666_v21 }
 0x423   : > { %v1640_v19 = vpop.f32.mrf.mxu0 }
 0x424   : > { %v1667_v2 = vmax.f32 %v1639_v32, 0.0  ;;  %v1689_v9 = vsel %vm956_vm8, %v1681_v17, 0.0 }
 0x425   : > { %1690 = vadd.xlane.f32.xlu0 %v1689_v9 }
 0x426   : > { %v1682_v8 = vmul.f32 %v1979_v12, %v1667_v2 }
 0x428   : > { %v1643_v14 = vpop.f32.mrf.mxu0  ;;  %v1692_v16 = vsel %vm956_vm8, %v1682_v8, 0.0 }
 0x429   : > { %v1644_v24 = vadd.f32 %v1965_v7, %v1643_v14  ;;  %1693 = vadd.xlane.f32.xlu1 %v1692_v16 }
 0x42a   : > { %v1645_v27 = vpop.f32.mrf.mxu0 }
 0x42b   : > { %v1668_v49 = vmax.f32 %v1644_v24, 0.0 }
 0x42c   : > { %v1646_v28 = vpop.f32.mrf.mxu0 }
 0x42d   : > { %v1647_v3 = vadd.f32 %v1965_v7, %v1646_v28  ;;  %v1683_v31 = vmul.f32 %v1979_v12, %v1668_v49 }
 0x42e   : > { %v1648_v23 = vpop.f32.mrf.mxu0 }
 0x42f   : > { %v1669_v4 = vmax.f32 %v1647_v3, 0.0  ;;  %v1695_v22 = vsel %vm956_vm8, %v1683_v31, 0.0 }
 0x430   : > { %1696 = vadd.xlane.f32.xlu0 %v1695_v22 }
 0x431   : > { %v1684_v35 = vmul.f32 %v1979_v12, %v1669_v4 }
 0x433   : > { %v1698_v18 = vsel %vm956_vm8, %v1684_v35, 0.0 }
 0x434   : > { %1699 = vadd.xlane.f32.xlu0 %v1698_v18 }
 0x437   : > { %v1651_v33 = vpop.f32.mrf.mxu0 }
 0x438   : > { %v1652_v37 = vadd.f32 %v1965_v7, %v1651_v33 }
 0x439   : > { %v1653_v39 = vpop.f32.mrf.mxu0 }
 0x43a   : > { %v1670_v42 = vmax.f32 %v1652_v37, 0.0  ;;  %v2468_v39 = vmov 1966171168  }
 0x43b   : > { %v1654_v11 = vpop.f32.mrf.mxu0 }
 0x43c   : > { %v1655_v43 = vadd.f32 %v1965_v7, %v1654_v11  ;;  %v1685_v48 = vmul.f32 %v1979_v12, %v1670_v42  ;;  %v1868_v42 = vunpack.c.l.s4 %v2468_v39  ;;  %v1870_v11 = vlaneseq }
 0x43d   : > { %v1656_v50 = vpop.f32.mrf.mxu0 }
 0x43e   : > { %v1671_v40 = vmax.f32 %v1655_v43, 0.0  ;;  %v1701_v38 = vsel %vm956_vm8, %v1685_v48, 0.0  ;;  %v1869_v43 = vunpack.c.0.s8 %v1868_v42  ;;  %v1871_v48 = vshrl.u32 %v1870_v11, 7 }
 0x43f   : > { %1702 = vadd.xlane.f32.xlu1 %v1701_v38  ;;  %vm1884_vm2 = vcmp.lt.s32.totalorder %v1870_v11, 256 }
 0x440   : > { %v1659_v29 = vpop.f32.mrf.mxu0  ;;  %v1686_v57 = vmul.f32 %v1979_v12, %v1671_v40 }
 0x441   : > { %v1660_v26 = vadd.f32 %v1965_v7, %v1659_v29 }
 0x442   : > { %v1661_v15 = vpop.f32.mrf.mxu0  ;;  %v1704_v47 = vsel %vm956_vm8, %v1686_v57, 0.0  ;;  %v1872_v57 = vsub.s32 %v1869_v43, %v1871_v48 }
 0x443   : > { %v1672_v51 = vmax.f32 %v1660_v26, 0.0  ;;  %1705 = vadd.xlane.f32.xlu0 %v1704_v47 }
 0x444   : > { %v1662_v53 = vpop.f32.mrf.mxu0 }
 0x445   : > { %v1663_v62 = vadd.f32 %v1965_v7, %v1662_v53  ;;  %v1687_v46 = vmul.f32 %v1979_v12, %v1672_v51  ;;  %v1729_v7 = vld [vmem:[%s3262_s9 + $0x8] sm:$0xff] }
 0x446   : > { %v1664_v36 = vpop.f32.mrf.mxu0  ;;  %1809 = vmatprep.subr.mxu1 %v1729_v7 }
 0x447   : > { %v1673_v54 = vmax.f32 %v1663_v62, 0.0  ;;  %v1707_v44 = vsel %vm956_vm8, %v1687_v46, 0.0  ;;  %1810 = vmatpush1.msra.mxu1 %v1728_v59 }
 0x448   : > { %1708 = vadd.xlane.f32.xlu1 %v1707_v44 }
 0x449   : > { %v1688_v55 = vmul.f32 %v1979_v12, %v1673_v54 }
 0x44b   : > { %v1710_v34 = vsel %vm956_vm8, %v1688_v55, 0.0 }
 0x44c   : > { %1711 = vadd.xlane.f32.xlu0 %v1710_v34 }
 0x4ae   : > { %v1691_v6 = vpop.xlane.xlu0 %1690 }
 0x4af   : > { %v1720_v12 = vadd.f32 %v1980_v5, %v1691_v6 }
 0x4b1   : > { %1744 = vxpose.xlu1.b32.start [1/8] (short) (narrow) %v1720_v12, 8 }
 0x4b2   : > { %v1694_v21 = vpop.xlane.xlu1 %1693 }
 0x4b3   : > { %v1721_v13 = vadd.f32 %v1980_v5, %v1694_v21 }
 0x4b5   : > { %1745 = vxpose.xlu1.b32.cont [2/8] (short) (narrow) %v1721_v13, 8 }
 0x4b9   : > { %v1697_v32 = vpop.xlane.xlu0 %1696 }
 0x4ba   : > { %v1722_v17 = vadd.f32 %v1980_v5, %v1697_v32 }
 0x4bc   : > { %1746 = vxpose.xlu1.b32.cont [3/8] (short) (narrow) %v1722_v17, 8 }
 0x4bd   : > { %v1700_v19 = vpop.xlane.xlu0 %1699 }
 0x4be   : > { %v1723_v2 = vadd.f32 %v1980_v5, %v1700_v19 }
 0x4c0   : > { %1747 = vxpose.xlu1.b32.cont [4/8] (short) (narrow) %v1723_v2, 8 }
 0x4c8   : > { %v1703_v9 = vpop.xlane.xlu1 %1702 }
 0x4c9   : > { %v1724_v14 = vadd.f32 %v1980_v5, %v1703_v9 }
 0x4cb   : > { %1748 = vxpose.xlu1.b32.cont [5/8] (short) (narrow) %v1724_v14, 8 }
 0x4cc   : > { %v1706_v8 = vpop.xlane.xlu0 %1705 }
 0x4cd   : > { %v1725_v24 = vadd.f32 %v1980_v5, %v1706_v8 }
 0x4cf   : > { %1749 = vxpose.xlu1.b32.cont [6/8] (short) (narrow) %v1725_v24, 8 }
 0x4d1   : > { %v1709_v16 = vpop.xlane.xlu1 %1708 }
 0x4d2   : > { %v1726_v27 = vadd.f32 %v1980_v5, %v1709_v16 }
 0x4d4   : > { %1750 = vxpose.xlu1.b32.cont [7/8] (short) (narrow) %v1726_v27, 8 }
 0x4d5   : > { %v1712_v49 = vpop.xlane.xlu0 %1711 }
 0x4d6   : > { %v1727_v28 = vadd.f32 %v1980_v5, %v1712_v49 }
 0x4d8   : > { %1751 = vxpose.xlu1.b32.end [8/8] (short) (narrow) %v1727_v28, 8 }
 0x538   : > { %v1760_v3 = vpop.trf.xlu1 }
 0x539   : > { %1981 = vmatmul.mubr.msk.f32.vlgmr.msra.gmra.mxu1 %vm1017_vm13, %v1760_v3 }
 0x5f9   : > { %v1845_v31 = vpop.f32.mrf.mxu1 }
 0x5fa   : > { %v1982_v23 = vmul.f32 -1.442695, %v1845_v31 }
 0x5fb   : > { %v1847_v4 = vpop.f32.mrf.mxu1 }
 0x5fc   : > { %2437 = vpow2.f32 %v1982_v23  ;;  %v1983_v22 = vmul.f32 -1.442695, %v1847_v4 }
 0x5fe   : > { %2439 = vpow2.f32 %v1983_v22 }
 0x609   : > { %v2438_v35 = vpop.eup %2437 }
 0x60a   : > { %v1856_v18 = vadd.f32 1.0, %v2438_v35 }
 0x60b   : > { %v2440_v33 = vpop.eup %2439 }
 0x60c   : > { %2441 = vrcp.f32 %v1856_v18  ;;  %v1857_v37 = vadd.f32 1.0, %v2440_v33 }
 0x60e   : > { %2443 = vrcp.f32 %v1857_v37 }
 0x619   : > { %v2442_v50 = vpop.eup %2441 }
 0x61a   : > { %v1862_v38 = vmul.f32 10.0, %v2442_v50 }
 0x61b   : > { %v2444_v40 = vpop.eup %2443 }
 0x61c   : > { %v1863_v29 = vmul.f32 10.0, %v2444_v40 }
 0x61e   : > { %v1866_v26 = vcombine.low %v1862_v38, %v1863_v29 }
 0x620   : > { %v1873_v15 = vrot.slane %v1866_v26, %v1872_v57 }
 0x622   : > { %v1880_v47 = vrot.slane %v1873_v15, %v1872_v57 }
 0x624   : > { %1886 = vst.msk [vmem:[%s359_s13] sm:$0x3] %vm1884_vm2, %v1880_v47 }
 0x625 PF: > { %s22_s15 = sadd.s32 1, %s2451_s15  }
 0x626   : > { %p19_p4 = scmp.ge.s32.totalorder %s22_s15, 4  }
 0x628   :  { %21 = sbr.rel (!%p19_p4) target bundleno = 3 (0x3), region = 90 }

</bundles_post_ra>
